<compile_context>
chip_gen: v6e
topology: v6e:2x2x1
jax: 0.10.0
libtpu: 0.0.40
codegen_flags: <defaults>
</compile_context>

<pallas_src>
import functools

import jax
import jax.numpy as jnp
from jax.experimental import pallas as pl
from jax.experimental.pallas import tpu as pltpu

LN_EPS = 1e-5


def _sa_kernel(x_ref, gamma_ref, beta_ref, wqk_ref, bqk_ref, o_ref,
               *, n_heads, head_dim, tb, v, c):
    # x_ref:   (TB, V, C)        TB (time,batch) slabs, channels last
    # gamma/beta: (1, C)         LayerNorm affine params
    # wqk:     (C, 2*HD)         fused Q|K projection weight (Q half pre-scaled)
    # bqk:     (1, 2*HD)         fused Q|K projection bias  (Q half pre-scaled)
    # o_ref:   (TB, H, V, V)     attention probabilities (float32)
    hd = n_heads * head_dim

    # Collapse TB slabs into rows (tile-aligned reshape: 16 % 8 == 0, minor dim unchanged).
    x = x_ref[...].reshape(tb * v, c).astype(jnp.float32)        # (TB*V, C)

    # LayerNorm over the channel axis.
    mean = jnp.mean(x, axis=-1, keepdims=True)
    xc = x - mean
    var = jnp.mean(xc * xc, axis=-1, keepdims=True)
    y = xc * jax.lax.rsqrt(var + LN_EPS)
    y = y * gamma_ref[0] + beta_ref[0]                           # (TB*V, C)

    # Fused Q|K projection: one lane-dense 2*HD-wide matmul per grid step.
    qk = jnp.dot(y, wqk_ref[...], preferred_element_type=jnp.float32) + bqk_ref[0]   # (TB*V, 2*HD)
    qk = qk.reshape(tb, v, 2 * hd)                               # tile-aligned split of rows
    q = qk[:, :, :hd]                                            # (TB, V, HD)  (already scaled)
    k = qk[:, :, hd:]                                            # (TB, V, HD)

    # Per-head scaled dot product + softmax (H is small & static -> unrolled).
    for h in range(n_heads):
        qh = q[:, :, h * head_dim:(h + 1) * head_dim]            # (TB, V, D)
        kh = k[:, :, h * head_dim:(h + 1) * head_dim]            # (TB, V, D)
        # Batched q @ k^T, contracting on D directly (no XLU transpose of kh).
        dots = jax.lax.dot_general(
            qh, kh, (((2,), (2,)), ((0,), (0,))),
            preferred_element_type=jnp.float32)                  # (TB, V, V)
        dots = dots - jnp.max(dots, axis=-1, keepdims=True)
        e = jnp.exp(dots)
        inv = pl.reciprocal(jnp.sum(e, axis=-1, keepdims=True), approx=True)
        o_ref[:, h, :, :] = e * inv
    # TODO(synk): a (TB, H*V*V) lane-dense output would need a non-tile-aligned (V,V)->(V*V)
    # relayout in-kernel; kept the natural (TB, H, V, V) store to guarantee clean lowering.


def self_attention_pallas(x, ln_gamma, ln_beta, to_qk_w, to_qk_b, *, n_heads, hidden_dim):
    """x: (N, C, T, V). Returns attn: (N*T, n_heads, V, V) float32."""
    N, C, T, V = x.shape
    HD = n_heads * hidden_dim
    scale = float(hidden_dim) ** (-0.5)
    B = N * T

    # n c t v -> n t v c -> (n t) v c
    y = jnp.transpose(x, (0, 2, 3, 1)).reshape(B, V, C).astype(jnp.float32)

    # PyTorch Linear: y @ W.T + b with W of shape (2*HD, C).  Keep Q and K fused into one
    # (C, 2*HD) matmul; fold the attention scale into the Q half of weight and bias.
    wqk = to_qk_w.T.astype(jnp.float32)                                   # (C, 2*HD)
    bqk = to_qk_b.astype(jnp.float32)                                     # (2*HD,)
    col_scale = jnp.concatenate([jnp.full((HD,), scale, jnp.float32),
                                 jnp.ones((HD,), jnp.float32)])
    wqk = wqk * col_scale[None, :]
    bqk = (bqk * col_scale).reshape(1, 2 * HD)
    gamma = ln_gamma.reshape(1, C).astype(jnp.float32)
    beta = ln_beta.reshape(1, C).astype(jnp.float32)

    # Batch several slabs per grid step (amortize per-step overhead); keep >=2 grid steps so
    # both TensorCores on v7x get work.
    if B % 8 == 0 and B >= 16:
        TB = 8
    elif B % 2 == 0:
        TB = B // 2
    else:
        TB = B
    grid = (B // TB,)

    kernel = functools.partial(_sa_kernel, n_heads=n_heads, head_dim=hidden_dim,
                               tb=TB, v=V, c=C)

    return pl.pallas_call(
        kernel,
        out_shape=jax.ShapeDtypeStruct((B, n_heads, V, V), jnp.float32),
        grid_spec=pltpu.PrefetchScalarGridSpec(
            num_scalar_prefetch=0,
            grid=grid,
            in_specs=[
                pl.BlockSpec((TB, V, C), lambda b: (b, 0, 0)),       # y slabs
                pl.BlockSpec((1, C), lambda b: (0, 0)),              # gamma (fetched once)
                pl.BlockSpec((1, C), lambda b: (0, 0)),              # beta
                pl.BlockSpec((C, 2 * HD), lambda b: (0, 0)),         # fused Wq|Wk
                pl.BlockSpec((1, 2 * HD), lambda b: (0, 0)),         # fused bq|bk
            ],
            out_specs=pl.BlockSpec((TB, n_heads, V, V), lambda b: (b, 0, 0, 0)),
        ),
        compiler_params=pltpu.CompilerParams(dimension_semantics=("parallel",)),
    )(y, gamma, beta, wqk, bqk)


def self_attention_ref(x, ln_gamma, ln_beta, to_qk_w, to_qk_b, *, n_heads, hidden_dim):
    """Pure-JAX reference reproducing the PyTorch SelfAttention.forward."""
    N, C, T, V = x.shape
    HD = n_heads * hidden_dim
    scale = float(hidden_dim) ** (-0.5)
    y = jnp.transpose(x, (0, 2, 3, 1))                      # (N, T, V, C)
    mean = jnp.mean(y, axis=-1, keepdims=True)
    var = jnp.mean((y - mean) ** 2, axis=-1, keepdims=True)
    y = (y - mean) / jnp.sqrt(var + LN_EPS) * ln_gamma + ln_beta
    y = y @ to_qk_w.T + to_qk_b                             # (N, T, V, 2*HD)
    q, k = y[..., :HD], y[..., HD:]
    q = q.reshape(N * T, V, n_heads, hidden_dim).transpose(0, 2, 1, 3)
    k = k.reshape(N * T, V, n_heads, hidden_dim).transpose(0, 2, 1, 3)
    dots = jnp.einsum('bhid,bhjd->bhij', q, k) * scale
    return jax.nn.softmax(dots, axis=-1).astype(jnp.float32)


if __name__ == "__main__":
    # Small shapes consistent with the module: x is (N, C, T, V)
    N, C, T, V = 2, 4, 8, 16
    hidden_dim, n_heads = 32, 2
    HD = hidden_dim * n_heads

    key = jax.random.PRNGKey(0)
    kx, kw, kb = jax.random.split(key, 3)
    x = jax.random.normal(kx, (N, C, T, V), dtype=jnp.float32)

    # Deterministic parameter init (matching module shapes):
    #   to_qk.weight ~ N(0, 1), shape (2*inner_dim, in_channels); bias small uniform.
    #   LayerNorm: gamma = 1, beta = 0.
    to_qk_w = jax.random.normal(kw, (2 * HD, C), dtype=jnp.float32)
    to_qk_b = jax.random.uniform(kb, (2 * HD,), dtype=jnp.float32,
                                 minval=-1.0 / (C ** 0.5), maxval=1.0 / (C ** 0.5))
    ln_gamma = jnp.ones((C,), dtype=jnp.float32)
    ln_beta = jnp.zeros((C,), dtype=jnp.float32)

    attn = self_attention_pallas(x, ln_gamma, ln_beta, to_qk_w, to_qk_b,
                                 n_heads=n_heads, hidden_dim=hidden_dim)
    attn = jax.block_until_ready(attn)

    ref = self_attention_ref(x, ln_gamma, ln_beta, to_qk_w, to_qk_b,
                             n_heads=n_heads, hidden_dim=hidden_dim)
    assert attn.shape == (N * T, n_heads, V, V)
    assert jnp.allclose(attn, ref, atol=2e-3, rtol=2e-3)

    print("KERNEL_OK")
</pallas_src>

<mosaic_0001>
module attributes {stable_mosaic.version = 11 : i64} {
  func.func @_sa_kernel(%arg0: i32, %arg1: memref<8x16x4xf32, #tpu.memory_space<vmem>>, %arg2: memref<1x4xf32, #tpu.memory_space<vmem>>, %arg3: memref<1x4xf32, #tpu.memory_space<vmem>>, %arg4: memref<4x128xf32, #tpu.memory_space<vmem>>, %arg5: memref<1x128xf32, #tpu.memory_space<vmem>>, %arg6: memref<8x2x16x16xf32, #tpu.memory_space<vmem>>) attributes {dimension_semantics = [#tpu.dimension_semantics<parallel>], iteration_bounds = array<i64: 2>, scalar_prefetch = 0 : i64, scratch_operands = 0 : i64, tpu.core_type = #tpu.core_type<tc>, window_params = [{transform_indices = @transform_0, window_bounds = array<i64: 8, 16, 4>}, {pipeline_mode = #tpu.pipeline_mode<synchronous>, transform_indices = @transform_1, window_bounds = array<i64: 1, 4>}, {pipeline_mode = #tpu.pipeline_mode<synchronous>, transform_indices = @transform_2, window_bounds = array<i64: 1, 4>}, {pipeline_mode = #tpu.pipeline_mode<synchronous>, transform_indices = @transform_3, window_bounds = array<i64: 4, 128>}, {pipeline_mode = #tpu.pipeline_mode<synchronous>, transform_indices = @transform_4, window_bounds = array<i64: 1, 128>}, {transform_indices = @transform_5, window_bounds = array<i64: 8, 2, 16, 16>}]} {
    %c0 = arith.constant 0 : index
    %c0_0 = arith.constant 0 : index
    %c0_1 = arith.constant 0 : index
    %0 = vector.load %arg1[%c0, %c0_0, %c0_1] : memref<8x16x4xf32, #tpu.memory_space<vmem>>, vector<8x16x4xf32>
    %1 = vector.shape_cast %0 : vector<8x16x4xf32> to vector<128x4xf32>
    %cst = arith.constant dense<0.000000e+00> : vector<128xf32>
    %2 = vector.multi_reduction <add>, %1, %cst [1] : vector<128x4xf32> to vector<128xf32>
    %3 = vector.shape_cast %2 : vector<128xf32> to vector<128x1xf32>
    %cst_2 = arith.constant 4.000000e+00 : f32
    %4 = vector.broadcast %cst_2 : f32 to vector<128x1xf32>
    %5 = arith.divf %3, %4 : vector<128x1xf32>
    %6 = vector.broadcast %5 : vector<128x1xf32> to vector<128x4xf32>
    %7 = arith.subf %1, %6 : vector<128x4xf32>
    %8 = arith.mulf %7, %7 : vector<128x4xf32>
    %cst_3 = arith.constant dense<0.000000e+00> : vector<128xf32>
    %9 = vector.multi_reduction <add>, %8, %cst_3 [1] : vector<128x4xf32> to vector<128xf32>
    %10 = vector.shape_cast %9 : vector<128xf32> to vector<128x1xf32>
    %cst_4 = arith.constant 4.000000e+00 : f32
    %11 = vector.broadcast %cst_4 : f32 to vector<128x1xf32>
    %12 = arith.divf %10, %11 : vector<128x1xf32>
    %cst_5 = arith.constant 9.99999974E-6 : f32
    %13 = vector.broadcast %cst_5 : f32 to vector<128x1xf32>
    %14 = arith.addf %12, %13 : vector<128x1xf32>
    %15 = math.rsqrt %14 : vector<128x1xf32>
    %16 = vector.broadcast %15 : vector<128x1xf32> to vector<128x4xf32>
    %17 = arith.mulf %7, %16 : vector<128x4xf32>
    %c0_6 = arith.constant 0 : index
    %c0_7 = arith.constant 0 : index
    %18 = vector.load %arg2[%c0_6, %c0_7] : memref<1x4xf32, #tpu.memory_space<vmem>>, vector<1x4xf32>
    %19 = vector.shape_cast %18 : vector<1x4xf32> to vector<4xf32>
    %20 = vector.shape_cast %19 : vector<4xf32> to vector<1x4xf32>
    %21 = vector.broadcast %20 : vector<1x4xf32> to vector<128x4xf32>
    %22 = arith.mulf %17, %21 : vector<128x4xf32>
    %c0_8 = arith.constant 0 : index
    %c0_9 = arith.constant 0 : index
    %23 = vector.load %arg3[%c0_8, %c0_9] : memref<1x4xf32, #tpu.memory_space<vmem>>, vector<1x4xf32>
    %24 = vector.shape_cast %23 : vector<1x4xf32> to vector<4xf32>
    %25 = vector.shape_cast %24 : vector<4xf32> to vector<1x4xf32>
    %26 = vector.broadcast %25 : vector<1x4xf32> to vector<128x4xf32>
    %27 = arith.addf %22, %26 : vector<128x4xf32>
    %c0_10 = arith.constant 0 : index
    %c0_11 = arith.constant 0 : index
    %28 = vector.load %arg4[%c0_10, %c0_11] : memref<4x128xf32, #tpu.memory_space<vmem>>, vector<4x128xf32>
    %cst_12 = arith.constant dense<0.000000e+00> : vector<128x128xf32>
    %29 = tpu.matmul %27, %28, %cst_12 {dimension_numbers = #tpu.dot_dimension_numbers<[1], [0], [0], [1], [0, 0, 1, 1], [], []>} : vector<128x4xf32>, vector<4x128xf32>, vector<128x128xf32> -> vector<128x128xf32>
    %c0_13 = arith.constant 0 : index
    %c0_14 = arith.constant 0 : index
    %30 = vector.load %arg5[%c0_13, %c0_14] : memref<1x128xf32, #tpu.memory_space<vmem>>, vector<1x128xf32>
    %31 = vector.shape_cast %30 : vector<1x128xf32> to vector<128xf32>
    %32 = vector.shape_cast %31 : vector<128xf32> to vector<1x128xf32>
    %33 = vector.broadcast %32 : vector<1x128xf32> to vector<128x128xf32>
    %34 = arith.addf %29, %33 : vector<128x128xf32>
    %35 = vector.shape_cast %34 : vector<128x128xf32> to vector<8x16x128xf32>
    %36 = vector.extract_strided_slice %35 {offsets = [0, 0, 0], sizes = [8, 16, 64], strides = [1, 1, 1]} : vector<8x16x128xf32> to vector<8x16x64xf32>
    %37 = vector.extract_strided_slice %35 {offsets = [0, 0, 64], sizes = [8, 16, 64], strides = [1, 1, 1]} : vector<8x16x128xf32> to vector<8x16x64xf32>
    %38 = vector.extract_strided_slice %36 {offsets = [0, 0, 0], sizes = [8, 16, 32], strides = [1, 1, 1]} : vector<8x16x64xf32> to vector<8x16x32xf32>
    %39 = vector.extract_strided_slice %37 {offsets = [0, 0, 0], sizes = [8, 16, 32], strides = [1, 1, 1]} : vector<8x16x64xf32> to vector<8x16x32xf32>
    %cst_15 = arith.constant dense<0.000000e+00> : vector<8x16x16xf32>
    %40 = tpu.matmul %38, %39, %cst_15 {dimension_numbers = #tpu.dot_dimension_numbers<[2], [2], [1], [1], [0, 0, 0, 1, 1, 1], [0], [0]>} : vector<8x16x32xf32>, vector<8x16x32xf32>, vector<8x16x16xf32> -> vector<8x16x16xf32>
    %cst_16 = arith.constant dense<0xFF800000> : vector<8x16xf32>
    %41 = vector.multi_reduction <maximumf>, %40, %cst_16 [2] : vector<8x16x16xf32> to vector<8x16xf32>
    %42 = vector.shape_cast %41 : vector<8x16xf32> to vector<8x16x1xf32>
    %43 = vector.broadcast %42 : vector<8x16x1xf32> to vector<8x16x16xf32>
    %44 = arith.subf %40, %43 : vector<8x16x16xf32>
    %45 = math.exp %44 : vector<8x16x16xf32>
    %cst_17 = arith.constant dense<0.000000e+00> : vector<8x16xf32>
    %46 = vector.multi_reduction <add>, %45, %cst_17 [2] : vector<8x16x16xf32> to vector<8x16xf32>
    %47 = vector.shape_cast %46 : vector<8x16xf32> to vector<8x16x1xf32>
    %48 = tpu.reciprocal %47 {approx = true} : vector<8x16x1xf32> -> vector<8x16x1xf32>
    %49 = vector.broadcast %48 : vector<8x16x1xf32> to vector<8x16x16xf32>
    %50 = arith.mulf %45, %49 : vector<8x16x16xf32>
    %c0_18 = arith.constant 0 : index
    %c0_19 = arith.constant 0 : index
    %c0_20 = arith.constant 0 : index
    %c0_21 = arith.constant 0 : index
    %51 = vector.load %arg6[%c0_18, %c0_19, %c0_20, %c0_21] : memref<8x2x16x16xf32, #tpu.memory_space<vmem>>, vector<8x1x16x16xf32>
    %52 = vector.shape_cast %51 : vector<8x1x16x16xf32> to vector<8x16x16xf32>
    %53 = vector.shape_cast %50 : vector<8x16x16xf32> to vector<8x1x16x16xf32>
    tpu.vector_store %arg6[%c0_18, %c0_19, %c0_20, %c0_21], %53 {strides = array<i32>} : memref<8x2x16x16xf32, #tpu.memory_space<vmem>>, vector<8x1x16x16xf32>,
    %54 = vector.extract_strided_slice %36 {offsets = [0, 0, 32], sizes = [8, 16, 32], strides = [1, 1, 1]} : vector<8x16x64xf32> to vector<8x16x32xf32>
    %55 = vector.extract_strided_slice %37 {offsets = [0, 0, 32], sizes = [8, 16, 32], strides = [1, 1, 1]} : vector<8x16x64xf32> to vector<8x16x32xf32>
    %cst_22 = arith.constant dense<0.000000e+00> : vector<8x16x16xf32>
    %56 = tpu.matmul %54, %55, %cst_22 {dimension_numbers = #tpu.dot_dimension_numbers<[2], [2], [1], [1], [0, 0, 0, 1, 1, 1], [0], [0]>} : vector<8x16x32xf32>, vector<8x16x32xf32>, vector<8x16x16xf32> -> vector<8x16x16xf32>
    %cst_23 = arith.constant dense<0xFF800000> : vector<8x16xf32>
    %57 = vector.multi_reduction <maximumf>, %56, %cst_23 [2] : vector<8x16x16xf32> to vector<8x16xf32>
    %58 = vector.shape_cast %57 : vector<8x16xf32> to vector<8x16x1xf32>
    %59 = vector.broadcast %58 : vector<8x16x1xf32> to vector<8x16x16xf32>
    %60 = arith.subf %56, %59 : vector<8x16x16xf32>
    %61 = math.exp %60 : vector<8x16x16xf32>
    %cst_24 = arith.constant dense<0.000000e+00> : vector<8x16xf32>
    %62 = vector.multi_reduction <add>, %61, %cst_24 [2] : vector<8x16x16xf32> to vector<8x16xf32>
    %63 = vector.shape_cast %62 : vector<8x16xf32> to vector<8x16x1xf32>
    %64 = tpu.reciprocal %63 {approx = true} : vector<8x16x1xf32> -> vector<8x16x1xf32>
    %65 = vector.broadcast %64 : vector<8x16x1xf32> to vector<8x16x16xf32>
    %66 = arith.mulf %61, %65 : vector<8x16x16xf32>
    %c0_25 = arith.constant 0 : index
    %c1 = arith.constant 1 : index
    %c0_26 = arith.constant 0 : index
    %c0_27 = arith.constant 0 : index
    %67 = vector.load %arg6[%c0_25, %c1, %c0_26, %c0_27] : memref<8x2x16x16xf32, #tpu.memory_space<vmem>>, vector<8x1x16x16xf32>
    %68 = vector.shape_cast %67 : vector<8x1x16x16xf32> to vector<8x16x16xf32>
    %69 = vector.shape_cast %66 : vector<8x16x16xf32> to vector<8x1x16x16xf32>
    tpu.vector_store %arg6[%c0_25, %c1, %c0_26, %c0_27], %69 {strides = array<i32>} : memref<8x2x16x16xf32, #tpu.memory_space<vmem>>, vector<8x1x16x16xf32>,
    return
  }
  func.func @transform_0(%arg0: i32) -> (i32, i32, i32) {
    %c0_i32 = arith.constant 0 : i32
    %c0_i32_0 = arith.constant 0 : i32
    %c0_i32_1 = arith.constant 0 : i32
    return %arg0, %c0_i32, %c0_i32_0 : i32, i32, i32
  }
  func.func @transform_1(%arg0: i32) -> (i32, i32) {
    %c0_i32 = arith.constant 0 : i32
    %c0_i32_0 = arith.constant 0 : i32
    %c0_i32_1 = arith.constant 0 : i32
    return %c0_i32, %c0_i32_0 : i32, i32
  }
  func.func @transform_2(%arg0: i32) -> (i32, i32) {
    %c0_i32 = arith.constant 0 : i32
    %c0_i32_0 = arith.constant 0 : i32
    %c0_i32_1 = arith.constant 0 : i32
    return %c0_i32, %c0_i32_0 : i32, i32
  }
  func.func @transform_3(%arg0: i32) -> (i32, i32) {
    %c0_i32 = arith.constant 0 : i32
    %c0_i32_0 = arith.constant 0 : i32
    %c0_i32_1 = arith.constant 0 : i32
    return %c0_i32, %c0_i32_0 : i32, i32
  }
  func.func @transform_4(%arg0: i32) -> (i32, i32) {
    %c0_i32 = arith.constant 0 : i32
    %c0_i32_0 = arith.constant 0 : i32
    %c0_i32_1 = arith.constant 0 : i32
    return %c0_i32, %c0_i32_0 : i32, i32
  }
  func.func @transform_5(%arg0: i32) -> (i32, i32, i32, i32) {
    %c0_i32 = arith.constant 0 : i32
    %c0_i32_0 = arith.constant 0 : i32
    %c0_i32_1 = arith.constant 0 : i32
    %c0_i32_2 = arith.constant 0 : i32
    return %arg0, %c0_i32, %c0_i32_0, %c0_i32_1 : i32, i32, i32, i32
  }
}

</mosaic_0001>

<bundles_post_ra>
// kernel: tpu_custom_call.1
= control target key start
LH: loop header
LB: loop body
LE: loop exit
PB: predicated region body
PF: predicated region fallthrough
CT: control target
= control target key end

     0   :  { %10 = vsyncpa [#allocation3], 0  ;;  %s4257_s0 = inlined_call_operand.vmem [shape: f32[16,16,4], index: 0, kind: input, shape index: {}]   ;;  %s4258_s1 = inlined_call_operand.vmem [shape: f32[1,4], index: 1, kind: input, shape index: {}]   ;;  %s4259_s2 = inlined_call_operand.vmem [shape: f32[1,4], index: 2, kind: input, shape index: {}]   ;;  %s4260_s3 = inlined_call_operand.vmem [shape: f32[4,128], index: 3, kind: input, shape index: {}]   ;;  %s4261_s4 = inlined_call_operand.vmem [shape: f32[1,128], index: 4, kind: input, shape index: {}]   ;;  %s4262_s5 = inlined_call_operand.hbm [shape: f32[16,2,16,16], index: 5, kind: output, shape index: {}]  }
   0x1   :  { %12 = vsyncpa [#allocation3 + $0x1], 0  ;;  %s3248_s18 = smov 0   ;;  %s3250_s19 = smov 0  }
   0x2   :  { %s3252_s20 = smov 0   ;;  %s3254_s21 = smov 0  }
   0x3 LB: > { %s3269_s22 = sadd.s32 4294967295, %s3210_s21   ;;  %s2610_s23 = sadd.s32 4294967294, %s3210_s21   ;;  %s3210_s21 = sphi %s3254_s21, %s4268_s21   ;;  %s3206_s20 = sphi %s3252_s20, %s4267_s20   ;;  %s3202_s19 = sphi %s3250_s19, %s4266_s19   ;;  %s3198_s18 = sphi %s3248_s18, %s4265_s18  }
   0x4   : > { %s3273_s24 = sadd.s32 1, %s3210_s21   ;;  %s135_s25 = sadd.s32 1, %s3206_s20 }
   0x5   : > { %s132_s26 = ssub.s32 %s3210_s21, %s3273_s24  ;;  %p145_p0 = scmp.ne.s32.totalorder %s3206_s20, %s3202_s19 }
   0x6   : > { %p133_p1 = scmp.eq.s32.totalorder %s132_s26, 0  ;;  %p146_p2 = scmp.eq.s32.totalorder %s3269_s22, 1 }
   0x7   : > { %p151_p3 = scmp.ne.s32.totalorder %s3202_s19, %s3198_s18  ;;  %p152_p4 = scmp.eq.s32.totalorder %s2610_s23, 1 }
   0x8   : > { %s3284_s27 = scalar_select %p133_p1, %s3206_s20, %s135_s25  }
   0x9   : > { %p3286_p5 = por %p146_p2, %p145_p0  ;;  %p3290_p6 = por %p152_p4, %p151_p3 }
   0xa   : > { %p2613_p7 = scmp.ge.s32.totalorder %s3210_s21, 1  ;;  %p192_p8 = scmp.lt.s32.totalorder %s3210_s21, 3 }
   0xc   : > { %p193_p9 = pnand %p2613_p7, %p192_p8 }
   0xd   : > { %s2615_s30 = sshll.u32 (!%p193_p9), %s3269_s22, 3  ;;  %s3212_s23 = smov (!%p193_p9), 64  }
   0xe   : > { %196 = sbr.rel (%p193_p9) target bundleno = 1264 (0x4f0), region = 40  ;;  %p222_p10 = scmp.lt.s32.totalorder (!%p193_p9), %s2615_s30, 15 }
   0xf   : > { %s3213_s25 = smov (!%p193_p9), 32   ;;  %s3214_s26 = smov (!%p193_p9), 96  }
  0x10   : > { %s2726_s8 = sshll.u32 (!%p193_p9), %s3269_s22, 12  ;;  %s3215_s14 = smov (!%p193_p9), [#allocation2]  }
  0x11   : > { %s4206_s12 = scalar_lea.hbm (!%p193_p9), %s4262_s5, %s2726_s8  ;;  %s3154_s15 = sshll.u32 (!%p193_p9), %s3215_s14, 4  ;;  %s3155_s15 = int_to_ptr.vmem [resolvable:$false] %s3154_s15 }
  0x12   : > { %s3156_s16 = scalar_lea.vmem (!%p193_p9), %s3155_s15, 8192 }
  0x13   : > { %s4270_s30 = smov (!%p222_p10, %s2615_s30), 15  ;;  %vm245_vm0 = vcmask 31744   ;;  %vm557_vm1 = vcmask 1043456   ;;  %vm712_vm2 = vcmask 261120   ;;  %vm1419_vm3 = vcmask 130048  }
  0x14   : > { %s2724_s6 = sshll.u32 %s4270_s30, 4  ;;  %s218_s30 = sand.u32 1, %s3202_s19  }
  0x15   : > { %s3300_s9 = scalar_lea.vmem %s4257_s0, %s2724_s6  ;;  %s2614_s6 = sshll.u32 %s218_s30, 8 }
  0x16   : > { %v229_v0 = vld [vmem:[%s3300_s9] sm:$0xff]  ;;  %v231_v1 = vld [vmem:[%s3300_s9 + $0x10] sm:$0xff]  ;;  %v230_v2 = vld [vmem:[%s3300_s9 + $0x8] sm:$0xff]  ;;  %s4109_s7 = scalar_lea.vmem [#allocation2], %s2614_s6  ;;  %s4217_s22 = scalar_lea.sflag [#allocation3], %s218_s30 }
  0x17   : > { %v246_v3 = vsel %vm245_vm0, %v229_v0, 0.0  ;;  %v252_v4 = vsel %vm245_vm0, %v231_v1, 0.0  ;;  %v232_v5 = vld [vmem:[%s3300_s9 + $0x18] sm:$0xff]  ;;  %v249_v6 = vsel %vm245_vm0, %v230_v2, 0.0  ;;  %v233_v8 = vld [vmem:[%s3300_s9 + $0x20] sm:$0xff]  ;;  %v234_v9 = vld [vmem:[%s3300_s9 + $0x28] sm:$0xff] }
  0x18   : > { %247 = vadd.xlane.f32.xlu0 %v246_v3  ;;  %253 = vadd.xlane.f32.xlu1 %v252_v4  ;;  %v255_v7 = vsel %vm245_vm0, %v232_v5, 0.0  ;;  %v258_v10 = vsel %vm245_vm0, %v233_v8, 0.0  ;;  %v261_v11 = vsel %vm245_vm0, %v234_v9, 0.0  ;;  %v3315_v12 = vld [vmem:[%s3300_s9 + $0x30] sm:$0xff]  ;;  %v3318_v13 = vld [vmem:[%s3300_s9 + $0x38] sm:$0xff]  ;;  %v3325_v16 = vld [vmem:[%s3300_s9 + $0x40] sm:$0xff] }
  0x19   : > { %v264_v14 = vsel %vm245_vm0, %v3315_v12, 0.0  ;;  %v267_v15 = vsel %vm245_vm0, %v3318_v13, 0.0  ;;  %v3328_v17 = vld [vmem:[%s3300_s9 + $0x48] sm:$0xff]  ;;  %v270_v18 = vsel %vm245_vm0, %v3325_v16, 0.0  ;;  %v3335_v20 = vld [vmem:[%s3300_s9 + $0x50] sm:$0xff]  ;;  %v3338_v21 = vld [vmem:[%s3300_s9 + $0x58] sm:$0xff] }
  0x1a   : > { %v273_v19 = vsel %vm245_vm0, %v3328_v17, 0.0  ;;  %v276_v22 = vsel %vm245_vm0, %v3335_v20, 0.0  ;;  %v279_v23 = vsel %vm245_vm0, %v3338_v21, 0.0  ;;  %v3345_v24 = vld [vmem:[%s3300_s9 + $0x60] sm:$0xff]  ;;  %v3348_v25 = vld [vmem:[%s3300_s9 + $0x68] sm:$0xff]  ;;  %v3355_v28 = vld [vmem:[%s3300_s9 + $0x70] sm:$0xff] }
  0x1b   : > { %v282_v26 = vsel %vm245_vm0, %v3345_v24, 0.0  ;;  %v285_v27 = vsel %vm245_vm0, %v3348_v25, 0.0  ;;  %v3358_v29 = vld [vmem:[%s3300_s9 + $0x78] sm:$0xff]  ;;  %v288_v30 = vsel %vm245_vm0, %v3355_v28, 0.0  ;;  %s2548_s9 = sshll.u32 %s4109_s7, 4  ;;  %s4208_s9 = int_to_ptr.vmem [resolvable:$true] %s2548_s9 }
  0x1c   : > { %250 = vadd.xlane.f32.xlu0 %v249_v6  ;;  %256 = vadd.xlane.f32.xlu1 %v255_v7  ;;  %v291_v31 = vsel %vm245_vm0, %v3358_v29, 0.0  ;;  %s3150_s13 = scalar_lea.vmem %s4208_s9, 4096  ;;  %p3157_p0 = scmp.lt.s32.totalorder %s4208_s9, %s3155_s15 }
  0x1d   : > { %p3151_p11 = scmp.ne.s32.totalorder %s4208_s9, %s3150_s13  ;;  %p3158_p1 = scmp.lt.s32.totalorder %s3156_s16, %s3150_s13 }
  0x1f   : > { %p3152_p12 = pnand %p3151_p11, %p3286_p5  ;;  %p3159_p2 = por %p3158_p1, %p3157_p0 }
  0x20   : > { %259 = vadd.xlane.f32.xlu0 %v258_v10  ;;  %262 = vadd.xlane.f32.xlu1 %v261_v11 }
  0x21   : > { %p3153_p13 = pneg %p3152_p12 }
  0x23   : > { %p3160_p3 = pnand %p3159_p2, %p3153_p13 }
  0x24   : > { %265 = vadd.xlane.f32.xlu0 %v264_v14  ;;  %268 = vadd.xlane.f32.xlu1 %v267_v15 }
  0x28   : > { %271 = vadd.xlane.f32.xlu0 %v270_v18  ;;  %274 = vadd.xlane.f32.xlu1 %v273_v19 }
  0x2c   : > { %277 = vadd.xlane.f32.xlu0 %v276_v22  ;;  %280 = vadd.xlane.f32.xlu1 %v279_v23 }
  0x30   : > { %283 = vadd.xlane.f32.xlu0 %v282_v26  ;;  %286 = vadd.xlane.f32.xlu1 %v285_v27 }
  0x34   : > { %289 = vadd.xlane.f32.xlu0 %v288_v30  ;;  %292 = vadd.xlane.f32.xlu1 %v291_v31 }
  0xa1   : > { %v248_v32 = vpop.xlane.xlu0 %247  ;;  %v254_v33 = vpop.xlane.xlu1 %253 }
  0xa2   : > { %v295_v34 = vmul.f32 0.25, %v248_v32  ;;  %v297_v35 = vmul.f32 0.25, %v254_v33 }
  0xa4   : > { %v3364_v36 = vsub.f32 %v229_v0, %v295_v34  ;;  %v3366_v37 = vsub.f32 %v231_v1, %v297_v35 }
  0xa5   : > { %v251_v38 = vpop.xlane.xlu0 %250  ;;  %v257_v39 = vpop.xlane.xlu1 %256 }
  0xa6   : > { %v296_v40 = vmul.f32 0.25, %v251_v38  ;;  %v298_v41 = vmul.f32 0.25, %v257_v39  ;;  %v327_v42 = vmul.f32 %v3364_v36, %v3364_v36  ;;  %v329_v43 = vmul.f32 %v3366_v37, %v3366_v37 }
  0xa8   : > { %v3372_v44 = vsub.f32 %v230_v2, %v296_v40  ;;  %v3374_v45 = vsub.f32 %v232_v5, %v298_v41  ;;  %v343_v46 = vsel %vm245_vm0, %v327_v42, 0.0  ;;  %v349_v49 = vsel %vm245_vm0, %v329_v43, 0.0 }
  0xa9   : > { %344 = vadd.xlane.f32.xlu0 %v343_v46  ;;  %v260_v47 = vpop.xlane.xlu0 %259  ;;  %v263_v48 = vpop.xlane.xlu1 %262 }
  0xaa   : > { %v299_v50 = vmul.f32 0.25, %v260_v47  ;;  %v300_v51 = vmul.f32 0.25, %v263_v48  ;;  %v328_v52 = vmul.f32 %v3372_v44, %v3372_v44  ;;  %v330_v53 = vmul.f32 %v3374_v45, %v3374_v45 }
  0xac   : > { %v3382_v54 = vsub.f32 %v233_v8, %v299_v50  ;;  %v3384_v55 = vsub.f32 %v234_v9, %v300_v51  ;;  %v346_v56 = vsel %vm245_vm0, %v328_v52, 0.0  ;;  %v352_v59 = vsel %vm245_vm0, %v330_v53, 0.0 }
  0xad   : > { %350 = vadd.xlane.f32.xlu0 %v349_v49  ;;  %347 = vadd.xlane.f32.xlu1 %v346_v56  ;;  %v266_v57 = vpop.xlane.xlu0 %265  ;;  %v269_v58 = vpop.xlane.xlu1 %268 }
  0xae   : > { %v301_v60 = vmul.f32 0.25, %v266_v57  ;;  %v302_v61 = vmul.f32 0.25, %v269_v58  ;;  %v331_v62 = vmul.f32 %v3382_v54, %v3382_v54  ;;  %v332_v63 = vmul.f32 %v3384_v55, %v3384_v55 }
  0xb0   : > { %v3393_v0 = vsub.f32 %v3315_v12, %v301_v60  ;;  %v3396_v1 = vsub.f32 %v3318_v13, %v302_v61  ;;  %v355_v2 = vsel %vm245_vm0, %v331_v62, 0.0  ;;  %v358_v5 = vsel %vm245_vm0, %v332_v63, 0.0 }
  0xb1   : > { %353 = vadd.xlane.f32.xlu1 %v352_v59  ;;  %356 = vadd.xlane.f32.xlu0 %v355_v2  ;;  %v272_v3 = vpop.xlane.xlu0 %271  ;;  %v275_v4 = vpop.xlane.xlu1 %274 }
  0xb2   : > { %v303_v6 = vmul.f32 0.25, %v272_v3  ;;  %v304_v7 = vmul.f32 0.25, %v275_v4  ;;  %v333_v8 = vmul.f32 %v3393_v0, %v3393_v0  ;;  %v334_v9 = vmul.f32 %v3396_v1, %v3396_v1 }
  0xb4   : > { %v3405_v10 = vsub.f32 %v3325_v16, %v303_v6  ;;  %v3408_v11 = vsub.f32 %v3328_v17, %v304_v7  ;;  %v361_v12 = vsel %vm245_vm0, %v333_v8, 0.0  ;;  %v364_v15 = vsel %vm245_vm0, %v334_v9, 0.0 }
  0xb5   : > { %359 = vadd.xlane.f32.xlu1 %v358_v5  ;;  %362 = vadd.xlane.f32.xlu0 %v361_v12  ;;  %v278_v13 = vpop.xlane.xlu0 %277  ;;  %v281_v14 = vpop.xlane.xlu1 %280 }
  0xb6   : > { %v305_v18 = vmul.f32 0.25, %v278_v13  ;;  %v306_v19 = vmul.f32 0.25, %v281_v14  ;;  %v335_v22 = vmul.f32 %v3405_v10, %v3405_v10  ;;  %v336_v16 = vmul.f32 %v3408_v11, %v3408_v11 }
  0xb8   : > { %v3417_v23 = vsub.f32 %v3335_v20, %v305_v18  ;;  %v3420_v17 = vsub.f32 %v3338_v21, %v306_v19  ;;  %v367_v26 = vsel %vm245_vm0, %v335_v22, 0.0  ;;  %v370_v31 = vsel %vm245_vm0, %v336_v16, 0.0 }
  0xb9   : > { %365 = vadd.xlane.f32.xlu1 %v364_v15  ;;  %368 = vadd.xlane.f32.xlu0 %v367_v26  ;;  %v284_v27 = vpop.xlane.xlu0 %283  ;;  %v287_v30 = vpop.xlane.xlu1 %286 }
  0xba   : > { %v307_v32 = vmul.f32 0.25, %v284_v27  ;;  %v308_v33 = vmul.f32 0.25, %v287_v30  ;;  %v337_v34 = vmul.f32 %v3417_v23, %v3417_v23  ;;  %v338_v20 = vmul.f32 %v3420_v17, %v3420_v17  ;;  %v3460_v27 = vld [vmem:[%s4258_s1] ss:$0 sm:$0xff] }
  0xbc   : > { %v3429_v35 = vsub.f32 %v3345_v24, %v307_v32  ;;  %v3432_v21 = vsub.f32 %v3348_v25, %v308_v33  ;;  %v373_v38 = vsel %vm245_vm0, %v337_v34, 0.0  ;;  %v376_v41 = vsel %vm245_vm0, %v338_v20, 0.0  ;;  %v3466_v20 = vld [vmem:[%s4259_s2] ss:$0 sm:$0xff] }
  0xbd   : > { %371 = vadd.xlane.f32.xlu1 %v370_v31  ;;  %374 = vadd.xlane.f32.xlu0 %v373_v38  ;;  %v290_v39 = vpop.xlane.xlu0 %289  ;;  %v293_v40 = vpop.xlane.xlu1 %292 }
  0xbe   : > { %v309_v42 = vmul.f32 0.25, %v290_v39  ;;  %v310_v43 = vmul.f32 0.25, %v293_v40  ;;  %v339_v46 = vmul.f32 %v3429_v35, %v3429_v35  ;;  %v340_v24 = vmul.f32 %v3432_v21, %v3432_v21 }
  0xc0   : > { %v3441_v47 = vsub.f32 %v3355_v28, %v309_v42  ;;  %v3444_v25 = vsub.f32 %v3358_v29, %v310_v43  ;;  %v379_v48 = vsel %vm245_vm0, %v339_v46, 0.0  ;;  %v382_v49 = vsel %vm245_vm0, %v340_v24, 0.0  ;;  %v501_v29 = vld [vmem:[%s4260_s3] sm:$0xf] }
  0xc1   : > { %377 = vadd.xlane.f32.xlu1 %v376_v41  ;;  %380 = vadd.xlane.f32.xlu0 %v379_v48 }
  0xc2   : > { %v341_v50 = vmul.f32 %v3441_v47, %v3441_v47  ;;  %v342_v51 = vmul.f32 %v3444_v25, %v3444_v25  ;;  %2808 = vmatprep.subr.msk.mxu0 %vm557_vm1, %v501_v29 }
  0xc3   : > { %2809 = vmatpush3.msk.msra.mxu0 %vm557_vm1, %v501_v29 }
  0xc4   : > { %v385_v52 = vsel %vm245_vm0, %v341_v50, 0.0  ;;  %v388_v28 = vsel %vm245_vm0, %v342_v51, 0.0 }
  0xc5   : > { %383 = vadd.xlane.f32.xlu1 %v382_v49  ;;  %386 = vadd.xlane.f32.xlu0 %v385_v52 }
  0xc9   : > { %389 = vadd.xlane.f32.xlu1 %v388_v28 }
 0x132   : > { %v345_v53 = vpop.xlane.xlu0 %344 }
 0x133   : > { %v391_v56 = vmul.f32 0.25, %v345_v53 }
 0x135   : > { %v407_v57 = vadd.f32 1e-05, %v391_v56 }
 0x136   : > { %v348_v58 = vpop.xlane.xlu1 %347  ;;  %v351_v59 = vpop.xlane.xlu0 %350 }
 0x137   : > { %2990 = vrsqrt.f32 %v407_v57  ;;  %v392_v60 = vmul.f32 0.25, %v348_v58  ;;  %v393_v61 = vmul.f32 0.25, %v351_v59 }
 0x139   : > { %v408_v62 = vadd.f32 1e-05, %v392_v60  ;;  %v409_v63 = vadd.f32 1e-05, %v393_v61 }
 0x13a   : > { %v354_v2 = vpop.xlane.xlu1 %353  ;;  %v357_v3 = vpop.xlane.xlu0 %356 }
 0x13b   : > { %2992 = vrsqrt.f32 %v408_v62  ;;  %v394_v4 = vmul.f32 0.25, %v354_v2  ;;  %v395_v5 = vmul.f32 0.25, %v357_v3 }
 0x13c   : > { %2994 = vrsqrt.f32 %v409_v63 }
 0x13d   : > { %v410_v6 = vadd.f32 1e-05, %v394_v4  ;;  %v411_v7 = vadd.f32 1e-05, %v395_v5 }
 0x13e   : > { %v360_v8 = vpop.xlane.xlu1 %359  ;;  %v363_v9 = vpop.xlane.xlu0 %362 }
 0x13f   : > { %2996 = vrsqrt.f32 %v410_v6  ;;  %v396_v12 = vmul.f32 0.25, %v360_v8  ;;  %v397_v13 = vmul.f32 0.25, %v363_v9 }
 0x140   : > { %2998 = vrsqrt.f32 %v411_v7 }
 0x141   : > { %v412_v14 = vadd.f32 1e-05, %v396_v12  ;;  %v413_v15 = vadd.f32 1e-05, %v397_v13 }
 0x142   : > { %v366_v18 = vpop.xlane.xlu1 %365  ;;  %v369_v19 = vpop.xlane.xlu0 %368 }
 0x143   : > { %3000 = vrsqrt.f32 %v412_v14  ;;  %v398_v22 = vmul.f32 0.25, %v366_v18  ;;  %v399_v16 = vmul.f32 0.25, %v369_v19 }
 0x144   : > { %v2991_v26 = vpop.eup %2990  ;;  %3002 = vrsqrt.f32 %v413_v15 }
 0x145   : > { %v414_v30 = vadd.f32 1e-05, %v398_v22  ;;  %v415_v31 = vadd.f32 1e-05, %v399_v16  ;;  %v439_v32 = vmul.f32 %v2991_v26, %v3364_v36 }
 0x146   : > { %v372_v33 = vpop.xlane.xlu1 %371  ;;  %v375_v34 = vpop.xlane.xlu0 %374 }
 0x147   : > { %3004 = vrsqrt.f32 %v414_v30  ;;  %v400_v38 = vmul.f32 0.25, %v372_v33  ;;  %v401_v39 = vmul.f32 0.25, %v375_v34  ;;  %v462_v40 = vmul.f32 %v3460_v27, %v439_v32 }
 0x148   : > { %v2993_v41 = vpop.eup %2992  ;;  %3006 = vrsqrt.f32 %v415_v31 }
 0x149   : > { %v2995_v42 = vpop.eup %2994  ;;  %v416_v43 = vadd.f32 1e-05, %v400_v38  ;;  %v417_v46 = vadd.f32 1e-05, %v401_v39  ;;  %v485_v24 = vadd.f32 %v3466_v20, %v462_v40  ;;  %v440_v36 = vmul.f32 %v2993_v41, %v3372_v44 }
 0x14a   : > { %v378_v48 = vpop.xlane.xlu1 %377  ;;  %v381_v49 = vpop.xlane.xlu0 %380  ;;  %v441_v50 = vmul.f32 %v2995_v42, %v3366_v37 }
 0x14b   : > { %3008 = vrsqrt.f32 %v416_v43  ;;  %v402_v51 = vmul.f32 0.25, %v378_v48  ;;  %v403_v52 = vmul.f32 0.25, %v381_v49  ;;  %2810 = vmatprep.mubr.msk.f32.mxu0 %vm245_vm0, %v485_v24  ;;  %v463_v28 = vmul.f32 %v3460_v27, %v440_v36 }
 0x14c   : > { %v2997_v29 = vpop.eup %2996  ;;  %3010 = vrsqrt.f32 %v417_v46  ;;  %v464_v53 = vmul.f32 %v3460_v27, %v441_v50 }
 0x14d   : > { %v2999_v56 = vpop.eup %2998  ;;  %v418_v57 = vadd.f32 1e-05, %v402_v51  ;;  %v419_v58 = vadd.f32 1e-05, %v403_v52  ;;  %v486_v44 = vadd.f32 %v3466_v20, %v463_v28  ;;  %v442_v59 = vmul.f32 %v2997_v29, %v3374_v45 }
 0x14e   : > { %v384_v60 = vpop.xlane.xlu1 %383  ;;  %v387_v37 = vpop.xlane.xlu0 %386  ;;  %v487_v61 = vadd.f32 %v3466_v20, %v464_v53  ;;  %v443_v62 = vmul.f32 %v2999_v56, %v3382_v54 }
 0x14f   : > { %3012 = vrsqrt.f32 %v418_v57  ;;  %v404_v63 = vmul.f32 0.25, %v384_v60  ;;  %v405_v2 = vmul.f32 0.25, %v387_v37  ;;  %2811 = vmatmul.mubr.msk.f32.vlgmr.msra.gmra.mxu0 %vm245_vm0, %v486_v44  ;;  %v465_v3 = vmul.f32 %v3460_v27, %v442_v59  ;;  %v3534_v44 = vld [vmem:[%s4261_s4] ss:$0 sm:$0xff] }
 0x150   : > { %v3001_v4 = vpop.eup %3000  ;;  %3014 = vrsqrt.f32 %v419_v58  ;;  %2813 = vmatprep.mubr.msk.f32.mxu0 %vm245_vm0, %v487_v61  ;;  %v466_v5 = vmul.f32 %v3460_v27, %v443_v62 }
 0x151   : > { %v3003_v45 = vpop.eup %3002  ;;  %v420_v6 = vadd.f32 1e-05, %v404_v63  ;;  %v421_v7 = vadd.f32 1e-05, %v405_v2  ;;  %v488_v8 = vadd.f32 %v3466_v20, %v465_v3  ;;  %v444_v54 = vmul.f32 %v3001_v4, %v3384_v55 }
 0x152   : > { %v390_v9 = vpop.xlane.xlu1 %389  ;;  %v489_v12 = vadd.f32 %v3466_v20, %v466_v5  ;;  %v445_v13 = vmul.f32 %v3003_v45, %v3393_v0 }
 0x153   : > { %3016 = vrsqrt.f32 %v420_v6  ;;  %v406_v14 = vmul.f32 0.25, %v390_v9  ;;  %2814 = vmatmul.mubr.msk.f32.gmra.mxu0 %vm245_vm0, %v488_v8  ;;  %v467_v15 = vmul.f32 %v3460_v27, %v444_v54 }
 0x154   : > { %v3005_v18 = vpop.eup %3004  ;;  %3018 = vrsqrt.f32 %v421_v7  ;;  %2816 = vmatprep.mubr.msk.f32.mxu0 %vm245_vm0, %v489_v12  ;;  %v468_v19 = vmul.f32 %v3460_v27, %v445_v13 }
 0x155   : > { %v3007_v22 = vpop.eup %3006  ;;  %v422_v16 = vadd.f32 1e-05, %v406_v14  ;;  %v490_v55 = vadd.f32 %v3466_v20, %v467_v15  ;;  %v446_v26 = vmul.f32 %v3005_v18, %v3396_v1 }
 0x156   : > { %v491_v0 = vadd.f32 %v3466_v20, %v468_v19  ;;  %v447_v30 = vmul.f32 %v3007_v22, %v3405_v10 }
 0x157   : > { %3020 = vrsqrt.f32 %v422_v16  ;;  %2817 = vmatmul.mubr.msk.f32.gmra.mxu0 %vm245_vm0, %v490_v55  ;;  %v469_v31 = vmul.f32 %v3460_v27, %v446_v26 }
 0x158   : > { %v3009_v32 = vpop.eup %3008  ;;  %2819 = vmatprep.mubr.msk.f32.mxu0 %vm245_vm0, %v491_v0  ;;  %v470_v33 = vmul.f32 %v3460_v27, %v447_v30 }
 0x159   : > { %v3011_v34 = vpop.eup %3010  ;;  %v492_v38 = vadd.f32 %v3466_v20, %v469_v31  ;;  %v448_v39 = vmul.f32 %v3009_v32, %v3408_v11 }
 0x15a   : > { %v493_v1 = vadd.f32 %v3466_v20, %v470_v33  ;;  %v449_v40 = vmul.f32 %v3011_v34, %v3417_v23 }
 0x15b   : > { %2820 = vmatmul.mubr.msk.f32.gmra.mxu0 %vm245_vm0, %v492_v38  ;;  %v471_v10 = vmul.f32 %v3460_v27, %v448_v39 }
 0x15c   : > { %v3013_v41 = vpop.eup %3012  ;;  %2822 = vmatprep.mubr.msk.f32.mxu0 %vm245_vm0, %v493_v1  ;;  %v472_v42 = vmul.f32 %v3460_v27, %v449_v40 }
 0x15d   : > { %v3015_v43 = vpop.eup %3014  ;;  %v494_v46 = vadd.f32 %v3466_v20, %v471_v10  ;;  %v450_v24 = vmul.f32 %v3013_v41, %v3420_v17 }
 0x15e   : > { %v495_v11 = vadd.f32 %v3466_v20, %v472_v42  ;;  %v451_v36 = vmul.f32 %v3015_v43, %v3429_v35 }
 0x15f   : > { %2823 = vmatmul.mubr.msk.f32.gmra.mxu0 %vm245_vm0, %v494_v46  ;;  %v473_v23 = vmul.f32 %v3460_v27, %v450_v24 }
 0x160   : > { %v3017_v48 = vpop.eup %3016  ;;  %2825 = vmatprep.mubr.msk.f32.mxu0 %vm245_vm0, %v495_v11  ;;  %v474_v49 = vmul.f32 %v3460_v27, %v451_v36 }
 0x161   : > { %v3019_v50 = vpop.eup %3018  ;;  %v496_v51 = vadd.f32 %v3466_v20, %v473_v23  ;;  %v452_v52 = vmul.f32 %v3017_v48, %v3432_v21 }
 0x162   : > { %v497_v17 = vadd.f32 %v3466_v20, %v474_v49  ;;  %v453_v28 = vmul.f32 %v3019_v50, %v3441_v47 }
 0x163   : > { %2826 = vmatmul.mubr.msk.f32.gmra.mxu0 %vm245_vm0, %v496_v51  ;;  %v475_v35 = vmul.f32 %v3460_v27, %v452_v52 }
 0x164   : > { %v3021_v29 = vpop.eup %3020  ;;  %2828 = vmatprep.mubr.msk.f32.mxu0 %vm245_vm0, %v497_v17  ;;  %v476_v53 = vmul.f32 %v3460_v27, %v453_v28 }
 0x165   : > { %v498_v56 = vadd.f32 %v3466_v20, %v475_v35  ;;  %v454_v57 = vmul.f32 %v3021_v29, %v3444_v25 }
 0x166   : > { %v499_v58 = vadd.f32 %v3466_v20, %v476_v53 }
 0x167   : > { %2829 = vmatmul.mubr.msk.f32.gmra.mxu0 %vm245_vm0, %v498_v56  ;;  %v477_v21 = vmul.f32 %v3460_v27, %v454_v57 }
 0x168   : > { %2831 = vmatprep.mubr.msk.f32.mxu0 %vm245_vm0, %v499_v58 }
 0x169   : > { %v500_v47 = vadd.f32 %v3466_v20, %v477_v21 }
 0x16b   : > { %2832 = vmatmul.mubr.msk.f32.gmra.mxu0 %vm245_vm0, %v500_v47 }
 0x20f   : > { %v2812_v59 = vpop.f32.mrf.mxu0 }
 0x210   : > { %v3537_v25 = vadd.f32 %v2812_v59, %v3534_v44 }
 0x211   : > { %v627_v60 = vpop.f32.mrf.mxu0 }
 0x212   : > { %v628_v37 = vadd.f32 %v3534_v44, %v627_v60  ;;  %710 = vrot.lane.b32.xlu0 %v3537_v25, %s3212_s23 }
 0x213   : > { %v2815_v27 = vpop.f32.mrf.mxu0 }
 0x214   : > { %708 = vrot.lane.b32.xlu1 %v628_v37, %s3212_s23  ;;  %2838 = vmatprep.mubr.msk.f32.mxu1 %vm712_vm2, %v628_v37  ;;  %v3545_v61 = vadd.f32 %v2815_v27, %v3534_v44 }
 0x215   : > { %v637_v20 = vpop.f32.mrf.mxu0 }
 0x216   : > { %1618 = vrot.lane.b32.xlu0 %v3537_v25, %s3213_s25  ;;  %v3559_v45 = vadd.f32 %v3534_v44, %v637_v20 }
 0x217   : > { %v2818_v62 = vpop.f32.mrf.mxu0 }
 0x218   : > { %800 = vrot.lane.b32.xlu1 %v3545_v61, %s3212_s23  ;;  %v3564_v7 = vadd.f32 %v2818_v62, %v3534_v44 }
 0x219   : > { %v647_v63 = vpop.f32.mrf.mxu0 }
 0x21a   : > { %1614 = vrot.lane.b32.xlu0 %v3537_v25, %s3214_s26  ;;  %v3576_v8 = vadd.f32 %v3534_v44, %v647_v63 }
 0x21b   : > { %v2821_v2 = vpop.f32.mrf.mxu0 }
 0x21c   : > { %1709 = vrot.lane.b32.xlu1 %v3545_v61, %s3213_s25  ;;  %v3583_v54 = vadd.f32 %v2821_v2, %v3534_v44 }
 0x21d   : > { %v657_v3 = vpop.f32.mrf.mxu0 }
 0x21e   : > { %1616 = vrot.lane.b32.xlu0 %v628_v37, %s3213_s25  ;;  %v3592_v12 = vadd.f32 %v3534_v44, %v657_v3 }
 0x21f   : > { %v2824_v4 = vpop.f32.mrf.mxu0 }
 0x220   : > { %1705 = vrot.lane.b32.xlu1 %v3545_v61, %s3214_s26  ;;  %v3597_v13 = vadd.f32 %v2824_v4, %v3534_v44 }
 0x221   : > { %v667_v5 = vpop.f32.mrf.mxu0 }
 0x222   : > { %v668_v6 = vadd.f32 %v3534_v44, %v667_v5  ;;  %1612 = vrot.lane.b32.xlu0 %v628_v37, %s3214_s26 }
 0x223   : > { %v2827_v9 = vpop.f32.mrf.mxu0 }
 0x224   : > { %798 = vrot.lane.b32.xlu1 %v3559_v45, %s3212_s23  ;;  %2866 = vmatprep.mubr.msk.f32.mxu0 %vm712_vm2, %v668_v6  ;;  %v3612_v22 = vadd.f32 %v2827_v9, %v3534_v44 }
 0x225   : > { %v677_v14 = vpop.f32.mrf.mxu0 }
 0x226   : > { %889 = vrot.lane.b32.xlu0 %v3564_v7, %s3212_s23  ;;  %v3622_v55 = vadd.f32 %v3534_v44, %v677_v14 }
 0x227   : > { %v2830_v15 = vpop.f32.mrf.mxu0 }
 0x228   : > { %1707 = vrot.lane.b32.xlu1 %v3559_v45, %s3213_s25  ;;  %v3607_v18 = vadd.f32 %v2830_v15, %v3534_v44 }
 0x229   : > { %v687_v19 = vpop.f32.mrf.mxu0 }
 0x22a   : > { %1800 = vrot.lane.b32.xlu0 %v3564_v7, %s3213_s25  ;;  %v3617_v16 = vadd.f32 %v3534_v44, %v687_v19 }
 0x22b   : > { %v2833_v26 = vpop.f32.mrf.mxu0 }
 0x22c   : > { %1703 = vrot.lane.b32.xlu1 %v3559_v45, %s3214_s26  ;;  %v3629_v0 = vadd.f32 %v2833_v26, %v3534_v44 }
 0x22d   : > { %v697_v30 = vpop.f32.mrf.mxu0 }
 0x22e   : > { %1798 = vrot.lane.b32.xlu0 %v3576_v8, %s3213_s25  ;;  %v3636_v31 = vadd.f32 %v3534_v44, %v697_v30 }
 0x230   : > { %887 = vrot.lane.b32.xlu1 %v3576_v8, %s3212_s23 }
 0x232   : > { %978 = vrot.lane.b32.xlu0 %v3583_v54, %s3212_s23 }
 0x234   : > { %1891 = vrot.lane.b32.xlu1 %v3583_v54, %s3213_s25 }
 0x236   : > { %1794 = vrot.lane.b32.xlu0 %v3576_v8, %s3214_s26 }
 0x238   : > { %976 = vrot.lane.b32.xlu1 %v3592_v12, %s3212_s23 }
 0x23a   : > { %1067 = vrot.lane.b32.xlu0 %v3597_v13, %s3212_s23 }
 0x23c   : > { %1889 = vrot.lane.b32.xlu1 %v3592_v12, %s3213_s25 }
 0x23e   : > { %1065 = vrot.lane.b32.xlu0 %v668_v6, %s3212_s23 }
 0x240   : > { %1885 = vrot.lane.b32.xlu1 %v3592_v12, %s3214_s26 }
 0x242   : > { %1245 = vrot.lane.b32.xlu0 %v3607_v18, %s3212_s23 }
 0x244   : > { %1156 = vrot.lane.b32.xlu1 %v3612_v22, %s3212_s23 }
 0x246   : > { %1243 = vrot.lane.b32.xlu0 %v3617_v16, %s3212_s23 }
 0x248   : > { %1154 = vrot.lane.b32.xlu1 %v3622_v55, %s3212_s23 }
 0x24a   : > { %1982 = vrot.lane.b32.xlu0 %v3597_v13, %s3213_s25 }
 0x24c   : > { %1334 = vrot.lane.b32.xlu1 %v3629_v0, %s3212_s23 }
 0x24e   : > { %1796 = vrot.lane.b32.xlu0 %v3564_v7, %s3214_s26 }
 0x250   : > { %1332 = vrot.lane.b32.xlu1 %v3636_v31, %s3212_s23 }
 0x252   : > { %1980 = vrot.lane.b32.xlu0 %v668_v6, %s3213_s25 }
 0x254   : > { %2073 = vrot.lane.b32.xlu1 %v3612_v22, %s3213_s25 }
 0x256   : > { %1976 = vrot.lane.b32.xlu0 %v668_v6, %s3214_s26 }
 0x258   : > { %1887 = vrot.lane.b32.xlu1 %v3583_v54, %s3214_s26 }
 0x25a   : > { %2164 = vrot.lane.b32.xlu0 %v3607_v18, %s3213_s25 }
 0x25c   : > { %2071 = vrot.lane.b32.xlu1 %v3622_v55, %s3213_s25 }
 0x25e   : > { %1978 = vrot.lane.b32.xlu0 %v3597_v13, %s3214_s26 }
 0x260   : > { %2067 = vrot.lane.b32.xlu1 %v3622_v55, %s3214_s26 }
 0x262   : > { %2162 = vrot.lane.b32.xlu0 %v3617_v16, %s3213_s25 }
 0x264   : > { %2255 = vrot.lane.b32.xlu1 %v3629_v0, %s3213_s25 }
 0x266   : > { %2158 = vrot.lane.b32.xlu0 %v3617_v16, %s3214_s26 }
 0x268   : > { %2069 = vrot.lane.b32.xlu1 %v3612_v22, %s3214_s26 }
 0x26a   : > { %2160 = vrot.lane.b32.xlu0 %v3607_v18, %s3214_s26 }
 0x26c   : > { %2253 = vrot.lane.b32.xlu1 %v3636_v31, %s3213_s25 }
 0x270   : > { %2249 = vrot.lane.b32.xlu1 %v3636_v31, %s3214_s26 }
 0x274   : > { %2251 = vrot.lane.b32.xlu1 %v3629_v0, %s3214_s26 }
 0x284   : > { %v711_v32 = vpop.permute.xlu0 %710 }
 0x285   : > { %2834 = vmatprep.subr.msk.mxu1 %vm712_vm2, %v711_v32 }
 0x286   : > { %v709_v33 = vpop.permute.xlu1 %708  ;;  %2835 = vmatpush3.xpose.msk.msra.mxu1 %vm712_vm2, %v711_v32 }
 0x287   : > { %2836 = vmatprep.subr.msk.mxu1 %vm712_vm2, %v709_v33 }
 0x288   : > { %v3675_v34 = vpop.permute.xlu0 %1618 }
 0x28a   : > { %v801_v38 = vpop.permute.xlu1 %800  ;;  %2837 = vmatpush3.xpose.msk.msra.mxu1 %vm712_vm2, %v709_v33 }
 0x28b   : > { %2841 = vmatprep.subr.msk.mxu1 %vm712_vm2, %v801_v38 }
 0x28c   : > { %v3679_v39 = vpop.permute.xlu0 %1614 }
 0x28d   : > { %2839 = vmatmul.mubr.msk.f32.vlgmr.msra.gmra.mxu1 %vm712_vm2, %v3537_v25 }
 0x28e   : > { %v3683_v1 = vpop.permute.xlu1 %1709  ;;  %2842 = vmatpush3.xpose.msk.msra.mxu1 %vm712_vm2, %v801_v38  ;;  %2845 = vmatprep.mubr.msk.f32.mxu1 %vm712_vm2, %v3559_v45 }
 0x290   : > { %v3688_v40 = vpop.permute.xlu0 %1616 }
 0x292   : > { %v3690_v10 = vpop.permute.xlu1 %1705 }
 0x294   : > { %v1613_v41 = vpop.permute.xlu0 %1612 }
 0x296   : > { %v799_v42 = vpop.permute.xlu1 %798 }
 0x297   : > { %2843 = vmatprep.subr.msk.mxu1 %vm712_vm2, %v799_v42 }
 0x298   : > { %2844 = vmatpush3.xpose.msk.msra.mxu1 %vm712_vm2, %v799_v42  ;;  %v890_v43 = vpop.permute.xlu0 %889 }
 0x299   : > { %2848 = vmatprep.subr.msk.mxu1 %vm712_vm2, %v890_v43 }
 0x29a   : > { %v3695_v46 = vpop.permute.xlu1 %1707 }
 0x29b   : > { %2846 = vmatmul.mubr.msk.f32.vlgmr.msra.gmra.mxu1 %vm712_vm2, %v3545_v61 }
 0x29c   : > { %2849 = vmatpush3.xpose.msk.msra.mxu1 %vm712_vm2, %v890_v43  ;;  %2852 = vmatprep.mubr.msk.f32.mxu1 %vm712_vm2, %v3576_v8  ;;  %v1801_v24 = vpop.permute.xlu0 %1800 }
 0x29e   : > { %v3702_v11 = vpop.permute.xlu1 %1703 }
 0x2a0   : > { %v3704_v36 = vpop.permute.xlu0 %1798 }
 0x2a2   : > { %v888_v23 = vpop.permute.xlu1 %887 }
 0x2a3   : > { %2850 = vmatprep.subr.msk.mxu1 %vm712_vm2, %v888_v23 }
 0x2a4   : > { %2851 = vmatpush3.xpose.msk.msra.mxu1 %vm712_vm2, %v888_v23  ;;  %v979_v48 = vpop.permute.xlu0 %978 }
 0x2a5   : > { %2855 = vmatprep.subr.msk.mxu1 %vm712_vm2, %v979_v48 }
 0x2a6   : > { %v3709_v49 = vpop.permute.xlu1 %1891 }
 0x2a7   : > { %2853 = vmatmul.mubr.msk.f32.vlgmr.msra.gmra.mxu1 %vm712_vm2, %v3564_v7 }
 0x2a8   : > { %2856 = vmatpush3.xpose.msk.msra.mxu1 %vm712_vm2, %v979_v48  ;;  %2859 = vmatprep.mubr.msk.f32.mxu1 %vm712_vm2, %v3592_v12  ;;  %v1795_v50 = vpop.permute.xlu0 %1794 }
 0x2aa   : > { %v977_v51 = vpop.permute.xlu1 %976 }
 0x2ab   : > { %2857 = vmatprep.subr.msk.mxu1 %vm712_vm2, %v977_v51 }
 0x2ac   : > { %2858 = vmatpush3.xpose.msk.msra.mxu1 %vm712_vm2, %v977_v51  ;;  %v1068_v52 = vpop.permute.xlu0 %1067 }
 0x2ad   : > { %2862 = vmatprep.subr.msk.mxu0 %vm712_vm2, %v1068_v52 }
 0x2ae   : > { %v3719_v17 = vpop.permute.xlu1 %1889  ;;  %2863 = vmatpush3.xpose.msk.msra.mxu0 %vm712_vm2, %v1068_v52 }
 0x2af   : > { %2860 = vmatmul.mubr.msk.f32.vlgmr.msra.gmra.mxu1 %vm712_vm2, %v3583_v54 }
 0x2b0   : > { %2873 = vmatprep.mubr.msk.f32.mxu1 %vm712_vm2, %v3622_v55  ;;  %v1066_v28 = vpop.permute.xlu0 %1065 }
 0x2b1   : > { %2864 = vmatprep.subr.msk.mxu0 %vm712_vm2, %v1066_v28 }
 0x2b2   : > { %v1886_v35 = vpop.permute.xlu1 %1885  ;;  %2865 = vmatpush3.xpose.msk.msra.mxu0 %vm712_vm2, %v1066_v28 }
 0x2b4   : > { %v1246_v29 = vpop.permute.xlu0 %1245 }
 0x2b5   : > { %2867 = vmatmul.mubr.msk.f32.vlgmr.msra.gmra.mxu0 %vm712_vm2, %v3597_v13  ;;  %2876 = vmatprep.subr.msk.mxu0 %vm712_vm2, %v1246_v29 }
 0x2b6   : > { %v1157_v53 = vpop.permute.xlu1 %1156  ;;  %2877 = vmatpush3.xpose.msk.msra.mxu0 %vm712_vm2, %v1246_v29  ;;  %2880 = vmatprep.mubr.msk.f32.mxu0 %vm712_vm2, %v3617_v16 }
 0x2b7   : > { %2869 = vmatprep.subr.msk.mxu1 %vm712_vm2, %v1157_v53 }
 0x2b8   : > { %2870 = vmatpush3.xpose.msk.msra.mxu1 %vm712_vm2, %v1157_v53  ;;  %v1244_v56 = vpop.permute.xlu0 %1243 }
 0x2b9   : > { %2878 = vmatprep.subr.msk.mxu0 %vm712_vm2, %v1244_v56 }
 0x2ba   : > { %v1155_v57 = vpop.permute.xlu1 %1154  ;;  %2879 = vmatpush3.xpose.msk.msra.mxu0 %vm712_vm2, %v1244_v56 }
 0x2bb   : > { %2871 = vmatprep.subr.msk.mxu1 %vm712_vm2, %v1155_v57  ;;  %2890 = vmatprep.subr.msk.mxu0 %vm712_vm2, %v3675_v34 }
 0x2bc   : > { %2872 = vmatpush3.xpose.msk.msra.mxu1 %vm712_vm2, %v1155_v57  ;;  %v1983_v58 = vpop.permute.xlu0 %1982 }
 0x2bd   : > { %2881 = vmatmul.mubr.msk.f32.vlgmr.msra.gmra.mxu0 %vm712_vm2, %v3607_v18 }
 0x2be   : > { %v1335_v21 = vpop.permute.xlu1 %1334  ;;  %2891 = vmatpush3.xpose.msk.msra.mxu0 %vm712_vm2, %v3675_v34  ;;  %2894 = vmatprep.mubr.msk.f32.mxu0 %vm712_vm2, %v1613_v41 }
 0x2bf   : > { %2874 = vmatmul.mubr.msk.f32.vlgmr.msra.gmra.mxu1 %vm712_vm2, %v3612_v22  ;;  %2883 = vmatprep.subr.msk.mxu1 %vm712_vm2, %v1335_v21 }
 0x2c0   : > { %2892 = vmatprep.subr.msk.mxu0 %vm712_vm2, %v3688_v40  ;;  %2884 = vmatpush3.xpose.msk.msra.mxu1 %vm712_vm2, %v1335_v21  ;;  %v1797_v47 = vpop.permute.xlu0 %1796 }
 0x2c1   : > { %2887 = vmatprep.mubr.msk.f32.mxu1 %vm712_vm2, %v3636_v31 }
 0x2c2   : > { %v1333_v44 = vpop.permute.xlu1 %1332  ;;  %2893 = vmatpush3.xpose.msk.msra.mxu0 %vm712_vm2, %v3688_v40 }
 0x2c3   : > { %2885 = vmatprep.subr.msk.mxu1 %vm712_vm2, %v1333_v44  ;;  %2904 = vmatprep.subr.msk.mxu0 %vm712_vm2, %v1801_v24 }
 0x2c4   : > { %2886 = vmatpush3.xpose.msk.msra.mxu1 %vm712_vm2, %v1333_v44  ;;  %v1981_v59 = vpop.permute.xlu0 %1980 }
 0x2c5   : > { %2895 = vmatmul.mubr.msk.f32.vlgmr.msra.gmra.mxu0 %vm712_vm2, %v3679_v39  ;;  %2897 = vmatprep.subr.msk.mxu1 %vm712_vm2, %v3683_v1 }
 0x2c6   : > { %v2074_v25 = vpop.permute.xlu1 %2073  ;;  %2905 = vmatpush3.xpose.msk.msra.mxu0 %vm712_vm2, %v1801_v24  ;;  %2908 = vmatprep.mubr.msk.f32.mxu0 %vm712_vm2, %v1795_v50 }
 0x2c7   : > { %2888 = vmatmul.mubr.msk.f32.vlgmr.msra.gmra.mxu1 %vm712_vm2, %v3629_v0  ;;  %2906 = vmatprep.subr.msk.mxu0 %vm712_vm2, %v3704_v36 }
 0x2c8   : > { %2898 = vmatpush3.xpose.msk.msra.mxu1 %vm712_vm2, %v3683_v1  ;;  %2901 = vmatprep.mubr.msk.f32.mxu1 %vm712_vm2, %v3702_v11  ;;  %v1977_v60 = vpop.permute.xlu0 %1976 }
 0x2c9   : > { %2899 = vmatprep.subr.msk.mxu1 %vm712_vm2, %v3695_v46 }
 0x2ca   : > { %v1888_v37 = vpop.permute.xlu1 %1887  ;;  %2907 = vmatpush3.xpose.msk.msra.mxu0 %vm712_vm2, %v3704_v36 }
 0x2cb   : > { %2918 = vmatprep.subr.msk.mxu0 %vm712_vm2, %v1983_v58 }
 0x2cc   : > { %2900 = vmatpush3.xpose.msk.msra.mxu1 %vm712_vm2, %v3695_v46  ;;  %v2165_v27 = vpop.permute.xlu0 %2164 }
 0x2cd   : > { %2909 = vmatmul.mubr.msk.f32.vlgmr.msra.gmra.mxu0 %vm712_vm2, %v1797_v47  ;;  %2911 = vmatprep.subr.msk.mxu1 %vm712_vm2, %v3709_v49 }
 0x2ce   : > { %v2072_v20 = vpop.permute.xlu1 %2071  ;;  %2919 = vmatpush3.xpose.msk.msra.mxu0 %vm712_vm2, %v1983_v58  ;;  %2922 = vmatprep.mubr.msk.f32.mxu0 %vm712_vm2, %v1977_v60 }
 0x2cf   : > { %2902 = vmatmul.mubr.msk.f32.vlgmr.msra.gmra.mxu1 %vm712_vm2, %v3690_v10  ;;  %2920 = vmatprep.subr.msk.mxu0 %vm712_vm2, %v1981_v59 }
 0x2d0   : > { %2912 = vmatpush3.xpose.msk.msra.mxu1 %vm712_vm2, %v3709_v49  ;;  %2915 = vmatprep.mubr.msk.f32.mxu1 %vm712_vm2, %v1886_v35  ;;  %v1979_v61 = vpop.permute.xlu0 %1978 }
 0x2d1   : > { %2913 = vmatprep.subr.msk.mxu1 %vm712_vm2, %v3719_v17 }
 0x2d2   : > { %v2068_v62 = vpop.permute.xlu1 %2067  ;;  %2921 = vmatpush3.xpose.msk.msra.mxu0 %vm712_vm2, %v1981_v59 }
 0x2d3   : > { %2932 = vmatprep.subr.msk.mxu0 %vm712_vm2, %v2165_v27 }
 0x2d4   : > { %2914 = vmatpush3.xpose.msk.msra.mxu1 %vm712_vm2, %v3719_v17  ;;  %v2163_v63 = vpop.permute.xlu0 %2162 }
 0x2d5   : > { %2923 = vmatmul.mubr.msk.f32.vlgmr.msra.gmra.mxu0 %vm712_vm2, %v1979_v61  ;;  %2925 = vmatprep.subr.msk.mxu1 %vm712_vm2, %v2074_v25 }
 0x2d6   : > { %v2256_v2 = vpop.permute.xlu1 %2255  ;;  %2933 = vmatpush3.xpose.msk.msra.mxu0 %vm712_vm2, %v2165_v27 }
 0x2d7   : > { %2916 = vmatmul.mubr.msk.f32.vlgmr.msra.gmra.mxu1 %vm712_vm2, %v1888_v37  ;;  %2934 = vmatprep.subr.msk.mxu0 %vm712_vm2, %v2163_v63 }
 0x2d8   : > { %2926 = vmatpush3.xpose.msk.msra.mxu1 %vm712_vm2, %v2074_v25  ;;  %2929 = vmatprep.mubr.msk.f32.mxu1 %vm712_vm2, %v2068_v62  ;;  %v2159_v3 = vpop.permute.xlu0 %2158 }
 0x2d9   : > { %2927 = vmatprep.subr.msk.mxu1 %vm712_vm2, %v2072_v20  ;;  %2936 = vmatprep.mubr.msk.f32.mxu0 %vm712_vm2, %v2159_v3 }
 0x2da   : > { %v2070_v4 = vpop.permute.xlu1 %2069  ;;  %2935 = vmatpush3.xpose.msk.msra.mxu0 %vm712_vm2, %v2163_v63 }
 0x2dc   : > { %2928 = vmatpush3.xpose.msk.msra.mxu1 %vm712_vm2, %v2072_v20  ;;  %v2161_v5 = vpop.permute.xlu0 %2160 }
 0x2dd   : > { %2937 = vmatmul.mubr.msk.f32.vlgmr.msra.gmra.mxu0 %vm712_vm2, %v2161_v5  ;;  %2939 = vmatprep.subr.msk.mxu1 %vm712_vm2, %v2256_v2 }
 0x2de   : > { %v2254_v45 = vpop.permute.xlu1 %2253 }
 0x2df   : > { %2930 = vmatmul.mubr.msk.f32.vlgmr.msra.gmra.mxu1 %vm712_vm2, %v2070_v4 }
 0x2e0   : > { %2940 = vmatpush3.xpose.msk.msra.mxu1 %vm712_vm2, %v2256_v2 }
 0x2e1   : > { %2941 = vmatprep.subr.msk.mxu1 %vm712_vm2, %v2254_v45 }
 0x2e2   : > { %v2250_v6 = vpop.permute.xlu1 %2249 }
 0x2e3   : > { %2943 = vmatprep.mubr.msk.f32.mxu1 %vm712_vm2, %v2250_v6 }
 0x2e4   : > { %2942 = vmatpush3.xpose.msk.msra.mxu1 %vm712_vm2, %v2254_v45 }
 0x2e6   : > { %v2252_v7 = vpop.permute.xlu1 %2251 }
 0x2e7   : > { %2944 = vmatmul.mubr.msk.f32.vlgmr.msra.gmra.mxu1 %vm712_vm2, %v2252_v7 }
 0x34d   : > { %v3817_v8 = vpop.f32.mrf.mxu1 }
 0x34e   : > { %v1423_v54 = vsel %vm1419_vm3, %v3817_v8, -inf }
 0x34f   : > { %1424 = vmax.xlane.f32.xlu1 %v1423_v54  ;;  %v3821_v9 = vpop.f32.mrf.mxu1 }
 0x350   : > { %v1420_v12 = vsel %vm1419_vm3, %v3821_v9, -inf }
 0x351   : > { %1421 = vmax.xlane.f32.xlu0 %v1420_v12 }
 0x35b   : > { %v3825_v13 = vpop.f32.mrf.mxu1 }
 0x35c   : > { %v1429_v14 = vsel %vm1419_vm3, %v3825_v13, -inf }
 0x35d   : > { %1430 = vmax.xlane.f32.xlu0 %v1429_v14  ;;  %v3829_v15 = vpop.f32.mrf.mxu1 }
 0x35e   : > { %v1426_v18 = vsel %vm1419_vm3, %v3829_v15, -inf }
 0x361   : > { %1427 = vmax.xlane.f32.xlu0 %v1426_v18 }
 0x367   : > { %v3833_v19 = vpop.f32.mrf.mxu1 }
 0x368   : > { %v1435_v22 = vsel %vm1419_vm3, %v3833_v19, -inf }
 0x369   : > { %1436 = vmax.xlane.f32.xlu1 %v1435_v22  ;;  %v3837_v16 = vpop.f32.mrf.mxu1 }
 0x36a   : > { %v1432_v55 = vsel %vm1419_vm3, %v3837_v16, -inf }
 0x36b   : > { %1433 = vmax.xlane.f32.xlu0 %v1432_v55 }
 0x36f   : > { %v3841_v26 = vpop.f32.mrf.mxu1 }
 0x370   : > { %v1441_v34 = vsel %vm1419_vm3, %v3841_v26, -inf }
 0x371   : > { %v3851_v33 = vpop.f32.mrf.mxu1 }
 0x372   : > { %v1438_v38 = vsel %vm1419_vm3, %v3851_v33, -inf }
 0x375   : > { %v3843_v0 = vpop.f32.mrf.mxu0 }
 0x376   : > { %v1447_v30 = vsel %vm1419_vm3, %v3843_v0, -inf }
 0x377   : > { %1448 = vmax.xlane.f32.xlu1 %v1447_v30  ;;  %v3847_v31 = vpop.f32.mrf.mxu0 }
 0x378   : > { %v1444_v32 = vsel %vm1419_vm3, %v3847_v31, -inf }
 0x379   : > { %1445 = vmax.xlane.f32.xlu0 %v1444_v32 }
 0x37b   : > { %1442 = vmax.xlane.f32.xlu1 %v1441_v34 }
 0x37d   : > { %1439 = vmax.xlane.f32.xlu0 %v1438_v38  ;;  %v3857_v39 = vpop.f32.mrf.mxu0 }
 0x37e   : > { %v1459_v1 = vsel %vm1419_vm3, %v3857_v39, -inf }
 0x37f   : > { %v3861_v40 = vpop.f32.mrf.mxu1  ;;  %1460 = vmax.xlane.f32.xlu1 %v1459_v1  ;;  %v3863_v10 = vpop.f32.mrf.mxu0 }
 0x380   : > { %v1456_v41 = vsel %vm1419_vm3, %v3863_v10, -inf  ;;  %v1453_v43 = vsel %vm1419_vm3, %v3861_v40, -inf }
 0x381   : > { %v3867_v42 = vpop.f32.mrf.mxu1  ;;  %1457 = vmax.xlane.f32.xlu0 %v1456_v41 }
 0x382   : > { %v1450_v46 = vsel %vm1419_vm3, %v3867_v42, -inf }
 0x383   : > { %1454 = vmax.xlane.f32.xlu1 %v1453_v43 }
 0x385   : > { %v3873_v24 = vpop.f32.mrf.mxu0  ;;  %1451 = vmax.xlane.f32.xlu0 %v1450_v46 }
 0x386   : > { %v2343_v11 = vsel %vm1419_vm3, %v3873_v24, -inf }
 0x387   : > { %v3877_v36 = vpop.f32.mrf.mxu1  ;;  %2344 = vmax.xlane.f32.xlu1 %v2343_v11  ;;  %v3879_v23 = vpop.f32.mrf.mxu0 }
 0x388   : > { %v2340_v48 = vsel %vm1419_vm3, %v3879_v23, -inf  ;;  %v1465_v50 = vsel %vm1419_vm3, %v3877_v36, -inf }
 0x389   : > { %v3883_v49 = vpop.f32.mrf.mxu1  ;;  %2341 = vmax.xlane.f32.xlu0 %v2340_v48 }
 0x38a   : > { %v1462_v51 = vsel %vm1419_vm3, %v3883_v49, -inf }
 0x38b   : > { %1466 = vmax.xlane.f32.xlu1 %v1465_v50 }
 0x38d   : > { %1463 = vmax.xlane.f32.xlu0 %v1462_v51  ;;  %v3889_v52 = vpop.f32.mrf.mxu0 }
 0x38e   : > { %v2355_v17 = vsel %vm1419_vm3, %v3889_v52, -inf }
 0x38f   : > { %v3893_v28 = vpop.f32.mrf.mxu1  ;;  %2356 = vmax.xlane.f32.xlu1 %v2355_v17  ;;  %v3895_v35 = vpop.f32.mrf.mxu0 }
 0x390   : > { %v2352_v29 = vsel %vm1419_vm3, %v3895_v35, -inf  ;;  %v2349_v56 = vsel %vm1419_vm3, %v3893_v28, -inf }
 0x391   : > { %v3899_v53 = vpop.f32.mrf.mxu1  ;;  %2353 = vmax.xlane.f32.xlu0 %v2352_v29 }
 0x392   : > { %v2346_v57 = vsel %vm1419_vm3, %v3899_v53, -inf }
 0x393   : > { %2350 = vmax.xlane.f32.xlu1 %v2349_v56 }
 0x395   : > { %2347 = vmax.xlane.f32.xlu0 %v2346_v57  ;;  %v3905_v58 = vpop.f32.mrf.mxu0 }
 0x396   : > { %v2367_v21 = vsel %vm1419_vm3, %v3905_v58, -inf }
 0x397   : > { %v3909_v47 = vpop.f32.mrf.mxu1  ;;  %2368 = vmax.xlane.f32.xlu1 %v2367_v21  ;;  %v3911_v44 = vpop.f32.mrf.mxu0 }
 0x398   : > { %v2364_v59 = vsel %vm1419_vm3, %v3911_v44, -inf  ;;  %v2361_v60 = vsel %vm1419_vm3, %v3909_v47, -inf }
 0x399   : > { %v3915_v25 = vpop.f32.mrf.mxu1  ;;  %2365 = vmax.xlane.f32.xlu0 %v2364_v59 }
 0x39a   : > { %v2358_v37 = vsel %vm1419_vm3, %v3915_v25, -inf }
 0x39b   : > { %2362 = vmax.xlane.f32.xlu1 %v2361_v60 }
 0x39d   : > { %2359 = vmax.xlane.f32.xlu0 %v2358_v37  ;;  %v3921_v27 = vpop.f32.mrf.mxu0 }
 0x39e   : > { %v2379_v20 = vsel %vm1419_vm3, %v3921_v27, -inf }
 0x39f   : > { %v3925_v61 = vpop.f32.mrf.mxu1  ;;  %2380 = vmax.xlane.f32.xlu1 %v2379_v20  ;;  %v3927_v62 = vpop.f32.mrf.mxu0 }
 0x3a0   : > { %v2376_v63 = vsel %vm1419_vm3, %v3927_v62, -inf  ;;  %v2373_v3 = vsel %vm1419_vm3, %v3925_v61, -inf }
 0x3a1   : > { %v3931_v2 = vpop.f32.mrf.mxu1  ;;  %2377 = vmax.xlane.f32.xlu0 %v2376_v63 }
 0x3a2   : > { %v2370_v4 = vsel %vm1419_vm3, %v3931_v2, -inf }
 0x3a3   : > { %2374 = vmax.xlane.f32.xlu1 %v2373_v3 }
 0x3a5   : > { %2371 = vmax.xlane.f32.xlu0 %v2370_v4 }
 0x3a7   : > { %v3937_v5 = vpop.f32.mrf.mxu1 }
 0x3a8   : > { %v2385_v45 = vsel %vm1419_vm3, %v3937_v5, -inf }
 0x3a9   : > { %v3941_v6 = vpop.f32.mrf.mxu1  ;;  %2386 = vmax.xlane.f32.xlu1 %v2385_v45 }
 0x3aa   : > { %v2382_v7 = vsel %vm1419_vm3, %v3941_v6, -inf }
 0x3ab   : > { %2383 = vmax.xlane.f32.xlu0 %v2382_v7 }
 0x3d8   : > { %v1425_v54 = vpop.xlane.xlu1 %1424 }
 0x3d9   : > { %v1469_v12 = vsub.f32 %v3817_v8, %v1425_v54 }
 0x3da   : > { %v1422_v14 = vpop.xlane.xlu0 %1421 }
 0x3db   : > { %v1486_v18 = vmul.f32 1.442695, %v1469_v12  ;;  %v1468_v22 = vsub.f32 %v3821_v9, %v1422_v14 }
 0x3dd   : > { %3022 = vpow2.f32 %v1486_v18  ;;  %v1484_v55 = vmul.f32 1.442695, %v1468_v22 }
 0x3df   : > { %3024 = vpow2.f32 %v1484_v55 }
 0x3e6   : > { %v1431_v30 = vpop.xlane.xlu0 %1430 }
 0x3e7   : > { %v1471_v32 = vsub.f32 %v3825_v13, %v1431_v30 }
 0x3e9   : > { %v1490_v34 = vmul.f32 1.442695, %v1471_v32 }
 0x3ea   : > { %v3948_v38 = vpop.eup %3022  ;;  %v1428_v1 = vpop.xlane.xlu0 %1427 }
 0x3eb   : > { %3026 = vpow2.f32 %v1490_v34  ;;  %v1470_v41 = vsub.f32 %v3829_v15, %v1428_v1  ;;  %v1519_v8 = vsel %vm1419_vm3, %v3948_v38, 0.0 }
 0x3ec   : > { %v3953_v43 = vpop.eup %3024  ;;  %1520 = vadd.xlane.f32.xlu1 %v1519_v8 }
 0x3ed   : > { %v1488_v9 = vmul.f32 1.442695, %v1470_v41  ;;  %v1516_v46 = vsel %vm1419_vm3, %v3953_v43, 0.0 }
 0x3ee   : > { %1517 = vadd.xlane.f32.xlu0 %v1516_v46 }
 0x3ef   : > { %3028 = vpow2.f32 %v1488_v9 }
 0x3f2   : > { %v1437_v13 = vpop.xlane.xlu1 %1436 }
 0x3f3   : > { %v1473_v11 = vsub.f32 %v3833_v19, %v1437_v13 }
 0x3f4   : > { %v1434_v48 = vpop.xlane.xlu0 %1433 }
 0x3f5   : > { %v1494_v50 = vmul.f32 1.442695, %v1473_v11  ;;  %v1472_v51 = vsub.f32 %v3837_v16, %v1434_v48 }
 0x3f7   : > { %3030 = vpow2.f32 %v1494_v50  ;;  %v1492_v15 = vmul.f32 1.442695, %v1472_v51 }
 0x3f8   : > { %v3959_v17 = vpop.eup %3026 }
 0x3f9   : > { %3032 = vpow2.f32 %v1492_v15  ;;  %v1525_v29 = vsel %vm1419_vm3, %v3959_v17, 0.0 }
 0x3fa   : > { %1526 = vadd.xlane.f32.xlu1 %v1525_v29 }
 0x3fc   : > { %v3963_v56 = vpop.eup %3028 }
 0x3fd   : > { %v1522_v57 = vsel %vm1419_vm3, %v3963_v56, 0.0 }
 0x3fe   : > { %1523 = vadd.xlane.f32.xlu0 %v1522_v57 }
 0x400   : > { %v1449_v19 = vpop.xlane.xlu1 %1448 }
 0x401   : > { %v1477_v21 = vsub.f32 %v3843_v0, %v1449_v19 }
 0x402   : > { %v1446_v59 = vpop.xlane.xlu0 %1445 }
 0x403   : > { %v1502_v16 = vmul.f32 1.442695, %v1477_v21  ;;  %v1476_v60 = vsub.f32 %v3847_v31, %v1446_v59 }
 0x404   : > { %v3969_v37 = vpop.eup %3030  ;;  %v1443_v20 = vpop.xlane.xlu1 %1442 }
 0x405   : > { %3034 = vpow2.f32 %v1502_v16  ;;  %v1500_v63 = vmul.f32 1.442695, %v1476_v60  ;;  %v1475_v3 = vsub.f32 %v3841_v26, %v1443_v20  ;;  %v1531_v4 = vsel %vm1419_vm3, %v3969_v37, 0.0 }
 0x406   : > { %v3974_v45 = vpop.eup %3032  ;;  %1532 = vadd.xlane.f32.xlu1 %v1531_v4  ;;  %v1440_v7 = vpop.xlane.xlu0 %1439 }
 0x407   : > { %3036 = vpow2.f32 %v1500_v63  ;;  %v1498_v0 = vmul.f32 1.442695, %v1475_v3  ;;  %v1474_v54 = vsub.f32 %v3851_v33, %v1440_v7  ;;  %v1528_v31 = vsel %vm1419_vm3, %v3974_v45, 0.0 }
 0x408   : > { %v1461_v12 = vpop.xlane.xlu1 %1460  ;;  %1529 = vadd.xlane.f32.xlu0 %v1528_v31 }
 0x409   : > { %3038 = vpow2.f32 %v1498_v0  ;;  %v1496_v14 = vmul.f32 1.442695, %v1474_v54  ;;  %v1481_v26 = vsub.f32 %v3857_v39, %v1461_v12 }
 0x40a   : > { %v1458_v18 = vpop.xlane.xlu0 %1457 }
 0x40b   : > { %3040 = vpow2.f32 %v1496_v14  ;;  %v1510_v22 = vmul.f32 1.442695, %v1481_v26  ;;  %v1480_v55 = vsub.f32 %v3863_v10, %v1458_v18 }
 0x40c   : > { %v1455_v30 = vpop.xlane.xlu1 %1454 }
 0x40d   : > { %3042 = vpow2.f32 %v1510_v22  ;;  %v1508_v32 = vmul.f32 1.442695, %v1480_v55  ;;  %v1479_v34 = vsub.f32 %v3861_v40, %v1455_v30 }
 0x40e   : > { %v1452_v33 = vpop.xlane.xlu0 %1451 }
 0x40f   : > { %3044 = vpow2.f32 %v1508_v32  ;;  %v1506_v1 = vmul.f32 1.442695, %v1479_v34  ;;  %v1478_v41 = vsub.f32 %v3867_v42, %v1452_v33 }
 0x410   : > { %v2345_v8 = vpop.xlane.xlu1 %2344 }
 0x411   : > { %3046 = vpow2.f32 %v1506_v1  ;;  %v1504_v9 = vmul.f32 1.442695, %v1478_v41  ;;  %v2389_v39 = vsub.f32 %v3873_v24, %v2345_v8 }
 0x412   : > { %v3984_v46 = vpop.eup %3034  ;;  %v2342_v13 = vpop.xlane.xlu0 %2341 }
 0x413   : > { %3048 = vpow2.f32 %v1504_v9  ;;  %v2406_v10 = vmul.f32 1.442695, %v2389_v39  ;;  %v2388_v11 = vsub.f32 %v3879_v23, %v2342_v13  ;;  %v1543_v40 = vsel %vm1419_vm3, %v3984_v46, 0.0 }
 0x414   : > { %v3989_v48 = vpop.eup %3036  ;;  %v1467_v50 = vpop.xlane.xlu1 %1466  ;;  %1544 = vadd.xlane.f32.xlu1 %v1543_v40 }
 0x415   : > { %3050 = vpow2.f32 %v2406_v10  ;;  %v2404_v42 = vmul.f32 1.442695, %v2388_v11  ;;  %v1483_v51 = vsub.f32 %v3877_v36, %v1467_v50  ;;  %v1540_v24 = vsel %vm1419_vm3, %v3989_v48, 0.0 }
 0x416   : > { %v3994_v15 = vpop.eup %3038  ;;  %1541 = vadd.xlane.f32.xlu0 %v1540_v24  ;;  %v1464_v29 = vpop.xlane.xlu0 %1463 }
 0x417   : > { %3052 = vpow2.f32 %v2404_v42  ;;  %v1514_v23 = vmul.f32 1.442695, %v1483_v51  ;;  %v1482_v57 = vsub.f32 %v3883_v49, %v1464_v29  ;;  %v1537_v19 = vsel %vm1419_vm3, %v3994_v15, 0.0 }
 0x418   : > { %v3999_v21 = vpop.eup %3040  ;;  %v2357_v59 = vpop.xlane.xlu1 %2356  ;;  %1538 = vadd.xlane.f32.xlu1 %v1537_v19 }
 0x419   : > { %3054 = vpow2.f32 %v1514_v23  ;;  %v1512_v36 = vmul.f32 1.442695, %v1482_v57  ;;  %v2393_v16 = vsub.f32 %v3889_v52, %v2357_v59  ;;  %v1534_v60 = vsel %vm1419_vm3, %v3999_v21, 0.0 }
 0x41a   : > { %v4004_v20 = vpop.eup %3042  ;;  %1535 = vadd.xlane.f32.xlu0 %v1534_v60  ;;  %v2354_v63 = vpop.xlane.xlu0 %2353 }
 0x41b   : > { %3056 = vpow2.f32 %v1512_v36  ;;  %v2414_v49 = vmul.f32 1.442695, %v2393_v16  ;;  %v2392_v3 = vsub.f32 %v3895_v35, %v2354_v63  ;;  %v1555_v4 = vsel %vm1419_vm3, %v4004_v20, 0.0 }
 0x41c   : > { %v4009_v7 = vpop.eup %3044  ;;  %v2351_v0 = vpop.xlane.xlu1 %2350  ;;  %1556 = vadd.xlane.f32.xlu1 %v1555_v4 }
 0x41d   : > { %3058 = vpow2.f32 %v2414_v49  ;;  %v2412_v52 = vmul.f32 1.442695, %v2392_v3  ;;  %v2391_v54 = vsub.f32 %v3893_v28, %v2351_v0  ;;  %v1552_v31 = vsel %vm1419_vm3, %v4009_v7, 0.0 }
 0x41e   : > { %v4014_v12 = vpop.eup %3046  ;;  %1553 = vadd.xlane.f32.xlu0 %v1552_v31  ;;  %v2348_v14 = vpop.xlane.xlu0 %2347 }
 0x41f   : > { %3060 = vpow2.f32 %v2412_v52  ;;  %v2410_v35 = vmul.f32 1.442695, %v2391_v54  ;;  %v2390_v26 = vsub.f32 %v3899_v53, %v2348_v14  ;;  %v1549_v18 = vsel %vm1419_vm3, %v4014_v12, 0.0 }
 0x420   : > { %v4019_v22 = vpop.eup %3048  ;;  %v2369_v55 = vpop.xlane.xlu1 %2368  ;;  %1550 = vadd.xlane.f32.xlu1 %v1549_v18 }
 0x421   : > { %3062 = vpow2.f32 %v2410_v35  ;;  %v2408_v28 = vmul.f32 1.442695, %v2390_v26  ;;  %v2397_v30 = vsub.f32 %v3905_v58, %v2369_v55  ;;  %v1546_v32 = vsel %vm1419_vm3, %v4019_v22, 0.0 }
 0x422   : > { %v4024_v34 = vpop.eup %3050  ;;  %1547 = vadd.xlane.f32.xlu0 %v1546_v32  ;;  %v2366_v33 = vpop.xlane.xlu0 %2365 }
 0x423   : > { %3064 = vpow2.f32 %v2408_v28  ;;  %v2422_v53 = vmul.f32 1.442695, %v2397_v30  ;;  %v2396_v1 = vsub.f32 %v3911_v44, %v2366_v33  ;;  %v2439_v41 = vsel %vm1419_vm3, %v4024_v34, 0.0 }
 0x424   : > { %v4029_v8 = vpop.eup %3052  ;;  %v2363_v9 = vpop.xlane.xlu1 %2362  ;;  %2440 = vadd.xlane.f32.xlu1 %v2439_v41 }
 0x425   : > { %3066 = vpow2.f32 %v2422_v53  ;;  %v2420_v58 = vmul.f32 1.442695, %v2396_v1  ;;  %v2395_v39 = vsub.f32 %v3909_v47, %v2363_v9  ;;  %v2436_v13 = vsel %vm1419_vm3, %v4029_v8, 0.0 }
 0x426   : > { %v4034_v10 = vpop.eup %3054  ;;  %2437 = vadd.xlane.f32.xlu0 %v2436_v13  ;;  %v2360_v11 = vpop.xlane.xlu0 %2359 }
 0x427   : > { %3068 = vpow2.f32 %v2420_v58  ;;  %v2418_v44 = vmul.f32 1.442695, %v2395_v39  ;;  %v2394_v40 = vsub.f32 %v3915_v25, %v2360_v11  ;;  %v1561_v50 = vsel %vm1419_vm3, %v4034_v10, 0.0 }
 0x428   : > { %v4039_v42 = vpop.eup %3056  ;;  %v2381_v51 = vpop.xlane.xlu1 %2380  ;;  %1562 = vadd.xlane.f32.xlu1 %v1561_v50 }
 0x429   : > { %3070 = vpow2.f32 %v2418_v44  ;;  %v2416_v47 = vmul.f32 1.442695, %v2394_v40  ;;  %v2401_v24 = vsub.f32 %v3921_v27, %v2381_v51  ;;  %v1558_v29 = vsel %vm1419_vm3, %v4039_v42, 0.0 }
 0x42a   : > { %v4044_v23 = vpop.eup %3058  ;;  %1559 = vadd.xlane.f32.xlu0 %v1558_v29  ;;  %v2378_v57 = vpop.xlane.xlu0 %2377 }
 0x42b   : > { %3072 = vpow2.f32 %v2416_v47  ;;  %v2430_v25 = vmul.f32 1.442695, %v2401_v24  ;;  %v2400_v19 = vsub.f32 %v3927_v62, %v2378_v57  ;;  %v2451_v59 = vsel %vm1419_vm3, %v4044_v23, 0.0 }
 0x42c   : > { %v4049_v36 = vpop.eup %3060  ;;  %v2375_v16 = vpop.xlane.xlu1 %2374  ;;  %2452 = vadd.xlane.f32.xlu1 %v2451_v59 }
 0x42d   : > { %3074 = vpow2.f32 %v2430_v25  ;;  %v2428_v27 = vmul.f32 1.442695, %v2400_v19  ;;  %v2399_v60 = vsub.f32 %v3925_v61, %v2375_v16  ;;  %v2448_v63 = vsel %vm1419_vm3, %v4049_v36, 0.0 }
 0x42e   : > { %v4054_v49 = vpop.eup %3062  ;;  %2449 = vadd.xlane.f32.xlu0 %v2448_v63  ;;  %v2372_v3 = vpop.xlane.xlu0 %2371 }
 0x42f   : > { %3076 = vpow2.f32 %v2428_v27  ;;  %v2426_v62 = vmul.f32 1.442695, %v2399_v60  ;;  %v2398_v4 = vsub.f32 %v3931_v2, %v2372_v3  ;;  %v2445_v0 = vsel %vm1419_vm3, %v4054_v49, 0.0 }
 0x430   : > { %v4059_v52 = vpop.eup %3064  ;;  %2446 = vadd.xlane.f32.xlu1 %v2445_v0 }
 0x431   : > { %3078 = vpow2.f32 %v2426_v62  ;;  %v2424_v54 = vmul.f32 1.442695, %v2398_v4  ;;  %v2442_v61 = vsel %vm1419_vm3, %v4059_v52, 0.0 }
 0x432   : > { %v4063_v31 = vpop.eup %3066  ;;  %v2387_v14 = vpop.xlane.xlu1 %2386  ;;  %2443 = vadd.xlane.f32.xlu0 %v2442_v61 }
 0x433   : > { %3080 = vpow2.f32 %v2424_v54  ;;  %v2403_v35 = vsub.f32 %v3937_v5, %v2387_v14  ;;  %v2463_v2 = vsel %vm1419_vm3, %v4063_v31, 0.0 }
 0x434   : > { %v4068_v26 = vpop.eup %3068  ;;  %2464 = vadd.xlane.f32.xlu1 %v2463_v2  ;;  %v2384_v18 = vpop.xlane.xlu0 %2383 }
 0x435   : > { %v2434_v55 = vmul.f32 1.442695, %v2403_v35  ;;  %v2402_v28 = vsub.f32 %v3941_v6, %v2384_v18  ;;  %v2460_v30 = vsel %vm1419_vm3, %v4068_v26, 0.0 }
 0x436   : > { %v4073_v32 = vpop.eup %3070  ;;  %2461 = vadd.xlane.f32.xlu0 %v2460_v30 }
 0x437   : > { %3082 = vpow2.f32 %v2434_v55  ;;  %v2432_v33 = vmul.f32 1.442695, %v2402_v28  ;;  %v2457_v5 = vsel %vm1419_vm3, %v4073_v32, 0.0 }
 0x438   : > { %v4077_v53 = vpop.eup %3072  ;;  %2458 = vadd.xlane.f32.xlu1 %v2457_v5 }
 0x439   : > { %3084 = vpow2.f32 %v2432_v33  ;;  %v2454_v1 = vsel %vm1419_vm3, %v4077_v53, 0.0 }
 0x43a   : > { %v4081_v41 = vpop.eup %3074  ;;  %2455 = vadd.xlane.f32.xlu0 %v2454_v1 }
 0x43b   : > { %v2475_v6 = vsel %vm1419_vm3, %v4081_v41, 0.0 }
 0x43c   : > { %v4085_v9 = vpop.eup %3076  ;;  %2476 = vadd.xlane.f32.xlu1 %v2475_v6 }
 0x43d   : > { %v2472_v58 = vsel %vm1419_vm3, %v4085_v9, 0.0 }
 0x43e   : > { %v4089_v39 = vpop.eup %3078  ;;  %2473 = vadd.xlane.f32.xlu0 %v2472_v58 }
 0x43f   : > { %v2469_v13 = vsel %vm1419_vm3, %v4089_v39, 0.0 }
 0x440   : > { %v4093_v11 = vpop.eup %3080  ;;  %2470 = vadd.xlane.f32.xlu1 %v2469_v13 }
 0x441   : > { %v2466_v44 = vsel %vm1419_vm3, %v4093_v11, 0.0 }
 0x442   : > { %2467 = vadd.xlane.f32.xlu0 %v2466_v44 }
 0x444   : > { %v4097_v40 = vpop.eup %3082 }
 0x445   : > { %v2481_v50 = vsel %vm1419_vm3, %v4097_v40, 0.0 }
 0x446   : > { %v4101_v51 = vpop.eup %3084  ;;  %2482 = vadd.xlane.f32.xlu1 %v2481_v50 }
 0x447   : > { %v2478_v47 = vsel %vm1419_vm3, %v4101_v51, 0.0 }
 0x448   : > { %2479 = vadd.xlane.f32.xlu0 %v2478_v47 }
 0x475   : > { %v1521_v24 = vpop.xlane.xlu1 %1520 }
 0x476   : > { %3086 = vrcp.f32 %v1521_v24 }
 0x477   : > { %v1518_v29 = vpop.xlane.xlu0 %1517 }
 0x478   : > { %3088 = vrcp.f32 %v1518_v29 }
 0x483   : > { %v3087_v57 = vpop.eup %3086  ;;  %v1527_v25 = vpop.xlane.xlu1 %1526 }
 0x484   : > { %v1581_v19 = vmul.f32 %v3087_v57, %v3948_v38  ;;  %3090 = vrcp.f32 %v1527_v25 }
 0x485   : > { %v3089_v59 = vpop.eup %3088 }
 0x486   : > { %1597 = vst.msk [vmem:[%s4109_s7 + $0x8] sm:$0xff] %vm1419_vm3, %v1581_v19  ;;  %v1580_v16 = vmul.f32 %v3089_v59, %v3953_v43 }
 0x487   : > { %v1524_v27 = vpop.xlane.xlu0 %1523 }
 0x488   : > { %1596 = vst.msk [vmem:[%s4109_s7] sm:$0xff] %vm1419_vm3, %v1580_v16  ;;  %3092 = vrcp.f32 %v1524_v27 }
 0x48f   : > { %v1533_v60 = vpop.xlane.xlu1 %1532 }
 0x490   : > { %3094 = vrcp.f32 %v1533_v60 }
 0x491   : > { %v3091_v38 = vpop.eup %3090  ;;  %v1530_v63 = vpop.xlane.xlu0 %1529 }
 0x492   : > { %v1583_v3 = vmul.f32 %v3091_v38, %v3959_v17  ;;  %3096 = vrcp.f32 %v1530_v63 }
 0x494   : > { %1599 = vst.msk [vmem:[%s4109_s7 + $0x28] sm:$0xff] %vm1419_vm3, %v1583_v3 }
 0x495   : > { %v3093_v62 = vpop.eup %3092 }
 0x496   : > { %v1582_v4 = vmul.f32 %v3093_v62, %v3963_v56 }
 0x498   : > { %1598 = vst.msk [vmem:[%s4109_s7 + $0x20] sm:$0xff] %vm1419_vm3, %v1582_v4 }
 0x49d   : > { %v3095_v43 = vpop.eup %3094  ;;  %v1545_v0 = vpop.xlane.xlu1 %1544 }
 0x49e   : > { %v1585_v54 = vmul.f32 %v3095_v43, %v3969_v37  ;;  %3098 = vrcp.f32 %v1545_v0 }
 0x49f   : > { %v3097_v61 = vpop.eup %3096  ;;  %v1542_v14 = vpop.xlane.xlu0 %1541 }
 0x4a0   : > { %1601 = vst.msk [vmem:[%s4109_s7 + $0x48] sm:$0xff] %vm1419_vm3, %v1585_v54  ;;  %v1584_v17 = vmul.f32 %v3097_v61, %v3974_v45  ;;  %3100 = vrcp.f32 %v1542_v14 }
 0x4a1   : > { %v1539_v35 = vpop.xlane.xlu1 %1538 }
 0x4a2   : > { %1600 = vst.msk [vmem:[%s4109_s7 + $0x40] sm:$0xff] %vm1419_vm3, %v1584_v17  ;;  %3102 = vrcp.f32 %v1539_v35 }
 0x4a3   : > { %v1536_v56 = vpop.xlane.xlu0 %1535 }
 0x4a4   : > { %3104 = vrcp.f32 %v1536_v56 }
 0x4a5   : > { %v1557_v2 = vpop.xlane.xlu1 %1556 }
 0x4a6   : > { %3106 = vrcp.f32 %v1557_v2 }
 0x4a7   : > { %v1554_v18 = vpop.xlane.xlu0 %1553 }
 0x4a8   : > { %3108 = vrcp.f32 %v1554_v18 }
 0x4a9   : > { %v1551_v37 = vpop.xlane.xlu1 %1550 }
 0x4aa   : > { %3110 = vrcp.f32 %v1551_v37 }
 0x4ab   : > { %v3099_v55 = vpop.eup %3098  ;;  %v1548_v28 = vpop.xlane.xlu0 %1547 }
 0x4ac   : > { %v1589_v45 = vmul.f32 %v3099_v55, %v3984_v46  ;;  %3112 = vrcp.f32 %v1548_v28 }
 0x4ad   : > { %v3101_v30 = vpop.eup %3100  ;;  %v2441_v33 = vpop.xlane.xlu1 %2440 }
 0x4ae   : > { %1605 = vst.msk [vmem:[%s4109_s7 + $0x88] sm:$0xff] %vm1419_vm3, %v1589_v45  ;;  %v1588_v5 = vmul.f32 %v3101_v30, %v3989_v48  ;;  %3114 = vrcp.f32 %v2441_v33 }
 0x4af   : > { %v3103_v1 = vpop.eup %3102  ;;  %v2438_v6 = vpop.xlane.xlu0 %2437 }
 0x4b0   : > { %1604 = vst.msk [vmem:[%s4109_s7 + $0x80] sm:$0xff] %vm1419_vm3, %v1588_v5  ;;  %v1587_v58 = vmul.f32 %v3103_v1, %v3994_v15  ;;  %3116 = vrcp.f32 %v2438_v6 }
 0x4b1   : > { %v3105_v13 = vpop.eup %3104  ;;  %v1563_v44 = vpop.xlane.xlu1 %1562 }
 0x4b2   : > { %1603 = vst.msk [vmem:[%s4109_s7 + $0x68] sm:$0xff] %vm1419_vm3, %v1587_v58  ;;  %v1586_v46 = vmul.f32 %v3105_v13, %v3999_v21  ;;  %3118 = vrcp.f32 %v1563_v44 }
 0x4b3   : > { %v3107_v50 = vpop.eup %3106  ;;  %v1560_v47 = vpop.xlane.xlu0 %1559 }
 0x4b4   : > { %1602 = vst.msk [vmem:[%s4109_s7 + $0x60] sm:$0xff] %vm1419_vm3, %v1586_v46  ;;  %v1593_v48 = vmul.f32 %v3107_v50, %v4004_v20  ;;  %3120 = vrcp.f32 %v1560_v47 }
 0x4b5   : > { %v3109_v24 = vpop.eup %3108  ;;  %v2453_v29 = vpop.xlane.xlu1 %2452 }
 0x4b6   : > { %1609 = vst.msk [vmem:[%s4109_s7 + $0xc8] sm:$0xff] %vm1419_vm3, %v1593_v48  ;;  %v1592_v15 = vmul.f32 %v3109_v24, %v4009_v7  ;;  %3122 = vrcp.f32 %v2453_v29 }
 0x4b7   : > { %v3111_v57 = vpop.eup %3110  ;;  %v2450_v25 = vpop.xlane.xlu0 %2449 }
 0x4b8   : > { %1608 = vst.msk [vmem:[%s4109_s7 + $0xc0] sm:$0xff] %vm1419_vm3, %v1592_v15  ;;  %v1591_v21 = vmul.f32 %v3111_v57, %v4014_v12  ;;  %3124 = vrcp.f32 %v2450_v25 }
 0x4b9   : > { %v3113_v19 = vpop.eup %3112  ;;  %v2447_v59 = vpop.xlane.xlu1 %2446 }
 0x4ba   : > { %1607 = vst.msk [vmem:[%s4109_s7 + $0xa8] sm:$0xff] %vm1419_vm3, %v1591_v21  ;;  %v1590_v20 = vmul.f32 %v3113_v19, %v4019_v22  ;;  %3126 = vrcp.f32 %v2447_v59 }
 0x4bb   : > { %v3115_v16 = vpop.eup %3114  ;;  %v2444_v27 = vpop.xlane.xlu0 %2443 }
 0x4bc   : > { %1606 = vst.msk [vmem:[%s4109_s7 + $0xa0] sm:$0xff] %vm1419_vm3, %v1590_v20  ;;  %v2501_v7 = vmul.f32 %v3115_v16, %v4024_v34  ;;  %3128 = vrcp.f32 %v2444_v27 }
 0x4bd   : > { %v3117_v60 = vpop.eup %3116  ;;  %v2465_v38 = vpop.xlane.xlu1 %2464 }
 0x4be   : > { %2703 = vst.msk [vmem:[%s4109_s7 + $0x18] sm:$0xff] %vm1419_vm3, %v2501_v7  ;;  %v2500_v12 = vmul.f32 %v3117_v60, %v4029_v8  ;;  %3130 = vrcp.f32 %v2465_v38 }
 0x4bf   : > { %v3119_v63 = vpop.eup %3118  ;;  %v2462_v3 = vpop.xlane.xlu0 %2461 }
 0x4c0   : > { %2702 = vst.msk [vmem:[%s4109_s7 + $0x10] sm:$0xff] %vm1419_vm3, %v2500_v12  ;;  %v1595_v22 = vmul.f32 %v3119_v63, %v4034_v10  ;;  %3132 = vrcp.f32 %v2462_v3 }
 0x4c1   : > { %v3121_v62 = vpop.eup %3120  ;;  %v2459_v4 = vpop.xlane.xlu1 %2458 }
 0x4c2   : > { %1611 = vst.msk [vmem:[%s4109_s7 + $0xe8] sm:$0xff] %vm1419_vm3, %v1595_v22  ;;  %v1594_v34 = vmul.f32 %v3121_v62, %v4039_v42  ;;  %3134 = vrcp.f32 %v2459_v4 }
 0x4c3   : > { %v3123_v43 = vpop.eup %3122  ;;  %v2456_v0 = vpop.xlane.xlu0 %2455 }
 0x4c4   : > { %1610 = vst.msk [vmem:[%s4109_s7 + $0xe0] sm:$0xff] %vm1419_vm3, %v1594_v34  ;;  %v2505_v8 = vmul.f32 %v3123_v43, %v4044_v23  ;;  %3136 = vrcp.f32 %v2456_v0 }
 0x4c5   : > { %v3125_v54 = vpop.eup %3124  ;;  %v2477_v61 = vpop.xlane.xlu1 %2476 }
 0x4c6   : > { %2707 = vst.msk [vmem:[%s4109_s7 + $0x58] sm:$0xff] %vm1419_vm3, %v2505_v8  ;;  %v2504_v10 = vmul.f32 %v3125_v54, %v4049_v36  ;;  %3138 = vrcp.f32 %v2477_v61 }
 0x4c7   : > { %v3127_v14 = vpop.eup %3126  ;;  %v2474_v42 = vpop.xlane.xlu0 %2473 }
 0x4c8   : > { %2706 = vst.msk [vmem:[%s4109_s7 + $0x50] sm:$0xff] %vm1419_vm3, %v2504_v10  ;;  %v2503_v17 = vmul.f32 %v3127_v14, %v4054_v49  ;;  %3140 = vrcp.f32 %v2474_v42 }
 0x4c9   : > { %v3129_v35 = vpop.eup %3128  ;;  %v2471_v23 = vpop.xlane.xlu1 %2470 }
 0x4ca   : > { %2705 = vst.msk [vmem:[%s4109_s7 + $0x38] sm:$0xff] %vm1419_vm3, %v2503_v17  ;;  %v2502_v56 = vmul.f32 %v3129_v35, %v4059_v52  ;;  %3142 = vrcp.f32 %v2471_v23 }
 0x4cb   : > { %v3131_v2 = vpop.eup %3130  ;;  %v2468_v36 = vpop.xlane.xlu0 %2467 }
 0x4cc   : > { %2704 = vst.msk [vmem:[%s4109_s7 + $0x30] sm:$0xff] %vm1419_vm3, %v2502_v56  ;;  %v2509_v18 = vmul.f32 %v3131_v2, %v4063_v31  ;;  %3144 = vrcp.f32 %v2468_v36 }
 0x4cd   : > { %v3133_v37 = vpop.eup %3132 }
 0x4ce   : > { %2711 = vst.msk [vmem:[%s4109_s7 + $0x98] sm:$0xff] %vm1419_vm3, %v2509_v18  ;;  %v2508_v49 = vmul.f32 %v3133_v37, %v4068_v26 }
 0x4cf   : > { %v3135_v55 = vpop.eup %3134  ;;  %v2483_v28 = vpop.xlane.xlu1 %2482 }
 0x4d0   : > { %2710 = vst.msk [vmem:[%s4109_s7 + $0x90] sm:$0xff] %vm1419_vm3, %v2508_v49  ;;  %v2507_v52 = vmul.f32 %v3135_v55, %v4073_v32  ;;  %3146 = vrcp.f32 %v2483_v28 }
 0x4d1   : > { %v3137_v45 = vpop.eup %3136  ;;  %v2480_v30 = vpop.xlane.xlu0 %2479 }
 0x4d2   : > { %2709 = vst.msk [vmem:[%s4109_s7 + $0x78] sm:$0xff] %vm1419_vm3, %v2507_v52  ;;  %v2506_v31 = vmul.f32 %v3137_v45, %v4077_v53  ;;  %3148 = vrcp.f32 %v2480_v30 }
 0x4d3   : > { %v3139_v26 = vpop.eup %3138 }
 0x4d4   : > { %2708 = vst.msk [vmem:[%s4109_s7 + $0x70] sm:$0xff] %vm1419_vm3, %v2506_v31  ;;  %v2513_v33 = vmul.f32 %v3139_v26, %v4081_v41 }
 0x4d5   : > { %v3141_v5 = vpop.eup %3140 }
 0x4d6   : > { %2715 = vst.msk [vmem:[%s4109_s7 + $0xd8] sm:$0xff] %vm1419_vm3, %v2513_v33  ;;  %v2512_v32 = vmul.f32 %v3141_v5, %v4085_v9 }
 0x4d7   : > { %v3143_v1 = vpop.eup %3142 }
 0x4d8   : > { %2714 = vst.msk [vmem:[%s4109_s7 + $0xd0] sm:$0xff] %vm1419_vm3, %v2512_v32  ;;  %v2511_v53 = vmul.f32 %v3143_v1, %v4089_v39 }
 0x4d9   : > { %v3145_v6 = vpop.eup %3144 }
 0x4da   : > { %2713 = vst.msk [vmem:[%s4109_s7 + $0xb8] sm:$0xff] %vm1419_vm3, %v2511_v53  ;;  %v2510_v58 = vmul.f32 %v3145_v6, %v4093_v11 }
 0x4dc   : > { %2712 = vst.msk [vmem:[%s4109_s7 + $0xb0] sm:$0xff] %vm1419_vm3, %v2510_v58 }
 0x4dd   : > { %v3147_v41 = vpop.eup %3146 }
 0x4de   : > { %v2515_v9 = vmul.f32 %v3147_v41, %v4097_v40 }
 0x4df   : > { %v3149_v13 = vpop.eup %3148 }
 0x4e0   : > { %2717 = vst.msk [vmem:[%s4109_s7 + $0xf8] sm:$0xff] %vm1419_vm3, %v2515_v9  ;;  %v2514_v39 = vmul.f32 %v3149_v13, %v4101_v51 }
 0x4e2   : > { %2716 = vst.msk [vmem:[%s4109_s7 + $0xf0] sm:$0xff] %vm1419_vm3, %v2514_v39 }
 0x4e3   : > { %3163 = shalt.err (!%p3160_p3)
}
 0x4e4   : > { %s3164_s17 = scalar_lea.hbm %s4206_s12, 4096  ;;  %s3168_s26 = scalar_lea.hbm %s4262_s5, 8192 }
 0x4e5   : > { %p3165_p4 = scmp.ne.s32.totalorder %s4206_s12, %s3164_s17  ;;  %p3169_p9 = scmp.lt.s32.totalorder %s4206_s12, %s4262_s5 }
 0x4e6   : > { %p3170_p10 = scmp.lt.s32.totalorder %s3168_s26, %s3164_s17 }
 0x4e7   : > { %p3166_p7 = pnand %p3165_p4, %p3286_p5 }
 0x4e8   : > { %p3171_p11 = por %p3170_p10, %p3169_p9 }
 0x4e9   : > { %p3167_p8 = pneg %p3166_p7 }
 0x4eb   : > { %p3172_p12 = pnand %p3171_p11, %p3167_p8 }
 0x4ed   : > { %3175 = shalt.err (!%p3172_p12)
}
 0x4ee   : > { %s3216_s7 = smov 128   ;;  %s3217_s8 = smov 8  }
 0x4ef   : > { %2946 = dma.vmem_to_hbm [thread:$0]  (%p3286_p5), %s4208_s9, 4096, %s4206_s12, %s4217_s22, %s3216_s7, %s3216_s7, %s3217_s8  }
 0x4f0 PF: > { %p2952_p13 = scmp.ge.s32.totalorder %s3210_s21, 2  ;;  %s2563_s10 = sand.u32 1, %s3198_s18  }
 0x4f1   : > { %s2564_s11 = scalar_lea.sflag [#allocation3], %s2563_s10 }
 0x4f2   : > { %p2949_p0 = pnand %p2952_p13, %p3290_p6 }
 0x4f4   : > { %p2950_p1 = pneg %p2949_p0 }
 0x4f6   : > { %3193 = dma.done.wait (%p2950_p1), %s2564_s11, 4096  }
 0x4f7   : > { %3195 = vsyncadd (%p2950_p1), %s2564_s11, 4294963200  ;;  %p15_p2 = scmp.ge.s32.totalorder %s3273_s24, 4   ;;  %s4265_s18 = smov %s3202_s19 }
 0x4f8   : > { %s4266_s19 = smov %s3206_s20  ;;  %s4267_s20 = smov %s3284_s27 }
 0x4f9   : > { %s4268_s21 = smov %s3273_s24  ;;  %17 = sbr.rel (!%p15_p2) target bundleno = 3 (0x3), region = 76 }
 0x4fe   :  { %2569 = vsyncpa [#allocation3], 1 }
 0x4ff   :  { %2571 = vsyncpa [#allocation3 + $0x1], 1 }

</bundles_post_ra>
